<compile_context>
chip_gen: v6e
topology: v6e:2x2x1
jax: 0.10.0
libtpu: 0.0.40
codegen_flags: <defaults>
</compile_context>

<pallas_src>
import jax
import jax.numpy as jnp
from jax.experimental import pallas as pl
from jax.experimental.pallas import tpu as pltpu


# ----------------------------------------------------------------------------
# Diffusion schedule (matches linear_beta_schedule + __init__ buffer math)
# ----------------------------------------------------------------------------
def linear_beta_schedule(n_timesteps, beta_start=1e-4, beta_end=2e-2):
    return jnp.linspace(beta_start, beta_end, n_timesteps, dtype=jnp.float32)


def make_schedule(n_timesteps):
    betas = linear_beta_schedule(n_timesteps)
    alphas = 1.0 - betas
    acp = jnp.cumprod(alphas, axis=0)
    acp_prev = jnp.concatenate([jnp.ones((1,), jnp.float32), acp[:-1]])
    posterior_variance = betas * (1.0 - acp_prev) / (1.0 - acp)
    sched = dict(
        sqrt_recip_alphas_cumprod=jnp.sqrt(1.0 / acp),
        sqrt_recipm1_alphas_cumprod=jnp.sqrt(1.0 / acp - 1.0),
        posterior_mean_coef1=betas * jnp.sqrt(acp_prev) / (1.0 - acp),
        posterior_mean_coef2=(1.0 - acp_prev) * jnp.sqrt(alphas) / (1.0 - acp),
        posterior_log_variance_clipped=jnp.log(
            jnp.maximum(posterior_variance, 1e-20)),
    )
    return {k: v.astype(jnp.float32) for k, v in sched.items()}


def sinusoidal_time_embedding(n_timesteps, dim):
    t = jnp.arange(n_timesteps, dtype=jnp.float32)[:, None]
    half = dim // 2
    freqs = jnp.exp(-jnp.log(10000.0) * jnp.arange(half, dtype=jnp.float32) / half)
    ang = t * freqs[None, :]
    return jnp.concatenate([jnp.sin(ang), jnp.cos(ang)], axis=-1)  # (T, dim)


# ----------------------------------------------------------------------------
# Pallas kernel: full reverse-diffusion sampling loop (single invocation)
# ----------------------------------------------------------------------------
def _p_sample_loop_kernel(
    coef_ref,     # SMEM (2*T,): [coef_x[0..T-1], coef_eps[0..T-1]]
    x0_ref,       # (B, Dp)      initial gaussian x_T (lane-padded, f32)
    noise_ref,    # (T, B, Dp)   fused per-step noise: std*noise - coef_eps*b3
    cond_ref,     # (B, Dcp)     concat(state, goal), bf16, lane-padded
    temb_ref,     # (T, B, Hp)   temb_table@Wt + b1, f32, broadcast over B
    wc_ref,       # (Dcp, Hp)    vstack(Ws, Wg), bf16
    wx_ref,       # (Dp, Hp)     bf16
    w2_ref,       # (Hp, Hp)     bf16
    w3_ref,       # (Hp, Dp)     bf16
    b2_ref,       # (1, Hp)      f32
    x_out_ref,    # (B, Dp)      final x_0 (aliases x0's HBM buffer)
):
    T = noise_ref.shape[0]
    B, Dp = x_out_ref.shape
    Hp = w2_ref.shape[1]

    # ---- hoisted, t-/x-independent conditioning term (one MXU op, once) -----
    h_const = jnp.dot(cond_ref[...], wc_ref[...],
                      preferred_element_type=jnp.float32)          # (B, Hp)
    # temb already contains b1; add h_const once -> per-step table (off chain)
    hct = temb_ref[...] + jnp.broadcast_to(h_const[None, :, :], (T, B, Hp))

    # ---- loop-invariant weights / pre-broadcast bias (hoisted) --------------
    wx = wx_ref[...]
    w2 = w2_ref[...]
    w3 = w3_ref[...]
    b2b = jnp.broadcast_to(b2_ref[...], (B, Hp))

    # ---- reverse diffusion: x carried in vregs; T is static so the loop -----
    # ---- fully unrolls at trace time (all indices static). ------------------
    # TODO(synk): switch to lax.fori_loop(unroll=2-4) if T grows beyond ~64.
    x = x0_ref[...]
    for i in range(T):
        t = T - 1 - i  # reversed(range(n_timesteps))

        # inner model: eps = MLP(state, x_t, goal, temb[t])  (predicts noise)
        h = jnp.maximum(
            jnp.dot(x.astype(jnp.bfloat16), wx,
                    preferred_element_type=jnp.float32) + hct[t], 0.0)
        h2 = jnp.maximum(
            jnp.dot(h.astype(jnp.bfloat16), w2,
                    preferred_element_type=jnp.float32) + b2b, 0.0)
        eps_w3 = jnp.dot(h2.astype(jnp.bfloat16), w3,
                         preferred_element_type=jnp.float32)

        # folded _predict_start_from_noise + _q_posterior + _p_sample update:
        #   mean = pmc1*(sra*x - srm1*eps) + pmc2*x
        #        = coef_x*x - coef_eps*(h2@w3 + b3)
        #   x    = mean + (t>0)*exp(0.5*logvar)*noise[t]
        # b3 and the std*noise term are pre-fused into noise_ref[t].
        x = coef_ref[t] * x - coef_ref[T + t] * eps_w3 + noise_ref[t]

    x_out_ref[...] = x


def p_sample_loop_pallas(state_flat, goal, x_init, noise_steps, temb_table,
                         params, sched, n_timesteps):
    B, Dx = x_init.shape
    H = params["w2"].shape[0]
    T = n_timesteps

    LANE = 128
    rup = lambda n: ((n + LANE - 1) // LANE) * LANE
    Dp, Hp = rup(Dx), rup(H)

    def pad(a, shape):
        return jnp.pad(a, [(0, s - d) for d, s in zip(a.shape, shape)])

    # ---- concatenated conditioning matmul (one MXU op), bf16 ---------------
    cond = jnp.concatenate([state_flat, goal], axis=-1)             # (B, Dc)
    wc = jnp.concatenate([params["ws"], params["wg"]], axis=0)      # (Dc, H)
    Dcp = rup(cond.shape[-1])
    cond_p = pad(cond, (B, Dcp)).astype(jnp.bfloat16)
    wc_p = pad(wc, (Dcp, Hp)).astype(jnp.bfloat16)

    # ---- bf16 weights for the per-step MXU chain (lane-padded, exact) ------
    wx_p = pad(params["wx"], (Dp, Hp)).astype(jnp.bfloat16)
    w2_p = pad(params["w2"], (Hp, Hp)).astype(jnp.bfloat16)
    w3_p = pad(params["w3"], (Hp, Dp)).astype(jnp.bfloat16)
    b2_p = pad(params["b2"], (1, Hp))                                # f32

    # ---- time-embedding projection + b1 folded, x-independent (XLA) --------
    temb_proj = temb_table @ params["wt"] + params["b1"]             # (T, H)
    temb_p = jnp.broadcast_to(pad(temb_proj, (T, Hp))[:, None, :], (T, B, Hp))
    temb_p = temb_p.astype(jnp.float32)

    # ---- folded per-timestep scalar coefficients -> flat SMEM table (2T,) --
    coef_x = (sched["posterior_mean_coef1"] * sched["sqrt_recip_alphas_cumprod"]
              + sched["posterior_mean_coef2"])
    coef_eps = (sched["posterior_mean_coef1"]
                * sched["sqrt_recipm1_alphas_cumprod"])
    std_eff = jnp.exp(0.5 * sched["posterior_log_variance_clipped"])
    std_eff = std_eff.at[0].set(0.0)          # t == 0: nonzero_mask == 0
    coefs = jnp.concatenate([coef_x, coef_eps]).astype(jnp.float32)  # (2T,)

    # ---- fuse std*noise - coef_eps*b3 host-side (off the serial chain) -----
    noise_fused = (std_eff[:, None, None] * noise_steps
                   - coef_eps[:, None, None] * params["b3"][None, :, :])
    noise_p = pad(noise_fused, (T, B, Dp)).astype(jnp.float32)

    x0_p = pad(x_init, (B, Dp)).astype(jnp.float32)

    vmem = pl.BlockSpec(memory_space=pltpu.MemorySpace.VMEM)
    smem = pl.BlockSpec(memory_space=pltpu.MemorySpace.SMEM)

    out_p = pl.pallas_call(
        _p_sample_loop_kernel,
        out_shape=jax.ShapeDtypeStruct((B, Dp), jnp.float32),
        in_specs=[smem] + [vmem] * 9,
        out_specs=vmem,
        input_output_aliases={1: 0},   # x0_p buffer reused for the output
    )(coefs, x0_p, noise_p, cond_p, temb_p, wc_p, wx_p, w2_p, w3_p, b2_p)

    return out_p[:, :Dx]


# ----------------------------------------------------------------------------
# Pure-JAX reference (mirrors the PyTorch forward-pass semantics, unfused, f32)
# ----------------------------------------------------------------------------
def ref_p_sample_loop(state_flat, goal, x_init, noise_steps, temb_table,
                      params, sched, n_timesteps):
    def model(x, t):
        h = (state_flat @ params["ws"] + x @ params["wx"]
             + goal @ params["wg"] + temb_table[t][None, :] @ params["wt"]
             + params["b1"])
        h = jnp.maximum(h, 0.0)
        h2 = jnp.maximum(h @ params["w2"] + params["b2"], 0.0)
        return h2 @ params["w3"] + params["b3"]

    x = x_init
    for t in reversed(range(n_timesteps)):
        eps = model(x, t)
        x_recon = (sched["sqrt_recip_alphas_cumprod"][t] * x
                   - sched["sqrt_recipm1_alphas_cumprod"][t] * eps)
        mean = (sched["posterior_mean_coef1"][t] * x_recon
                + sched["posterior_mean_coef2"][t] * x)
        logv = sched["posterior_log_variance_clipped"][t]
        mask = 0.0 if t == 0 else 1.0
        x = mean + mask * jnp.exp(0.5 * logv) * noise_steps[t]
    return x


# ----------------------------------------------------------------------------
if __name__ == "__main__":
    # small shapes consistent with the module
    B = 2
    T_obs, state_dim = 1, 32         # perceptual_emb: (B, T_obs, state_dim)
    action_seq_len, action_dim = 8, 4
    goal_dim = 32
    hidden = 64
    temb_dim = 16
    n_timesteps = 8
    Dx = action_seq_len * action_dim

    key = jax.random.PRNGKey(0)
    ks = jax.random.split(key, 14)

    # inputs to forward(if_train=False): perceptual_emb, latent_goal
    perceptual_emb = jax.random.normal(ks[0], (B, T_obs, state_dim), jnp.float32)
    latent_goal = jax.random.normal(ks[1], (B, goal_dim), jnp.float32)

    # deterministic synthetic inner-model parameters
    # TODO(synk): the real inner model is hydra-instantiated; a 2-hidden-layer
    # conditioned MLP noise predictor is used in its place.
    scale = 0.05
    params = dict(
        ws=scale * jax.random.normal(ks[2], (T_obs * state_dim, hidden), jnp.float32),
        wx=scale * jax.random.normal(ks[3], (Dx, hidden), jnp.float32),
        wg=scale * jax.random.normal(ks[4], (goal_dim, hidden), jnp.float32),
        wt=scale * jax.random.normal(ks[5], (temb_dim, hidden), jnp.float32),
        b1=jnp.zeros((1, hidden), jnp.float32),
        w2=scale * jax.random.normal(ks[6], (hidden, hidden), jnp.float32),
        b2=jnp.zeros((1, hidden), jnp.float32),
        w3=scale * jax.random.normal(ks[7], (hidden, Dx), jnp.float32),
        b3=jnp.zeros((1, Dx), jnp.float32),
    )

    sched = make_schedule(n_timesteps)
    temb_table = sinusoidal_time_embedding(n_timesteps, temb_dim)

    # torch.randn draws from _p_sample_loop / _p_sample, precomputed host-side
    # (the kernel consumes them as inputs so the loop is fully deterministic)
    x_init = jax.random.normal(ks[8], (B, Dx), jnp.float32)          # x_T
    noise_steps = jax.random.normal(ks[9], (n_timesteps, B, Dx), jnp.float32)

    state_flat = perceptual_emb.reshape(B, T_obs * state_dim)

    out_flat = p_sample_loop_pallas(state_flat, latent_goal, x_init,
                                    noise_steps, temb_table, params, sched,
                                    n_timesteps)
    out = out_flat.reshape(B, action_seq_len, action_dim)  # denoise_actions shape
    jax.block_until_ready(out)

    ref = ref_p_sample_loop(state_flat, latent_goal, x_init, noise_steps,
                            temb_table, params, sched, n_timesteps)
    ref = ref.reshape(B, action_seq_len, action_dim)

    assert out.shape == (B, action_seq_len, action_dim)
    # bf16 MXU operands -> loose-ish tolerance vs. the all-f32 reference
    assert jnp.allclose(out, ref, atol=2e-2, rtol=2e-2), (
        f"max diff {jnp.max(jnp.abs(out - ref))}")

    print("KERNEL_OK")
</pallas_src>

<mosaic_0001>
module attributes {stable_mosaic.version = 11 : i64} {
  func.func @_p_sample_loop_kernel(%arg0: memref<16xf32, #tpu.memory_space<smem>>, %arg1: memref<2x128xf32, #tpu.memory_space<vmem>>, %arg2: memref<8x2x128xf32, #tpu.memory_space<vmem>>, %arg3: memref<2x128xbf16, #tpu.memory_space<vmem>>, %arg4: memref<8x2x128xf32, #tpu.memory_space<vmem>>, %arg5: memref<128x128xbf16, #tpu.memory_space<vmem>>, %arg6: memref<128x128xbf16, #tpu.memory_space<vmem>>, %arg7: memref<128x128xbf16, #tpu.memory_space<vmem>>, %arg8: memref<128x128xbf16, #tpu.memory_space<vmem>>, %arg9: memref<1x128xf32, #tpu.memory_space<vmem>>, %arg10: memref<2x128xf32, #tpu.memory_space<vmem>>) attributes {dimension_semantics = [], scalar_prefetch = 0 : i64, scratch_operands = 0 : i64, tpu.core_type = #tpu.core_type<tc>} {
    %c0 = arith.constant 0 : index
    %c0_0 = arith.constant 0 : index
    %0 = vector.load %arg3[%c0, %c0_0] : memref<2x128xbf16, #tpu.memory_space<vmem>>, vector<2x128xbf16>
    %c0_1 = arith.constant 0 : index
    %c0_2 = arith.constant 0 : index
    %1 = vector.load %arg5[%c0_1, %c0_2] : memref<128x128xbf16, #tpu.memory_space<vmem>>, vector<128x128xbf16>
    %cst = arith.constant dense<0.000000e+00> : vector<2x128xf32>
    %2 = tpu.matmul %0, %1, %cst {dimension_numbers = #tpu.dot_dimension_numbers<[1], [0], [0], [1], [0, 0, 1, 1], [], []>} : vector<2x128xbf16>, vector<128x128xbf16>, vector<2x128xf32> -> vector<2x128xf32>
    %c0_3 = arith.constant 0 : index
    %c0_4 = arith.constant 0 : index
    %c0_5 = arith.constant 0 : index
    %3 = vector.load %arg4[%c0_3, %c0_4, %c0_5] : memref<8x2x128xf32, #tpu.memory_space<vmem>>, vector<8x2x128xf32>
    %4 = vector.shape_cast %2 : vector<2x128xf32> to vector<1x2x128xf32>
    %5 = vector.shape_cast %4 : vector<1x2x128xf32> to vector<1x2x128xf32>
    %6 = vector.broadcast %5 : vector<1x2x128xf32> to vector<8x2x128xf32>
    %7 = arith.addf %3, %6 : vector<8x2x128xf32>
    %c0_6 = arith.constant 0 : index
    %c0_7 = arith.constant 0 : index
    %8 = vector.load %arg6[%c0_6, %c0_7] : memref<128x128xbf16, #tpu.memory_space<vmem>>, vector<128x128xbf16>
    %c0_8 = arith.constant 0 : index
    %c0_9 = arith.constant 0 : index
    %9 = vector.load %arg7[%c0_8, %c0_9] : memref<128x128xbf16, #tpu.memory_space<vmem>>, vector<128x128xbf16>
    %c0_10 = arith.constant 0 : index
    %c0_11 = arith.constant 0 : index
    %10 = vector.load %arg8[%c0_10, %c0_11] : memref<128x128xbf16, #tpu.memory_space<vmem>>, vector<128x128xbf16>
    %c0_12 = arith.constant 0 : index
    %c0_13 = arith.constant 0 : index
    %11 = vector.load %arg9[%c0_12, %c0_13] : memref<1x128xf32, #tpu.memory_space<vmem>>, vector<1x128xf32>
    %12 = vector.shape_cast %11 : vector<1x128xf32> to vector<1x128xf32>
    %13 = vector.broadcast %12 : vector<1x128xf32> to vector<2x128xf32>
    %c0_14 = arith.constant 0 : index
    %c0_15 = arith.constant 0 : index
    %14 = vector.load %arg1[%c0_14, %c0_15] : memref<2x128xf32, #tpu.memory_space<vmem>>, vector<2x128xf32>
    %15 = arith.truncf %14 : vector<2x128xf32> to vector<2x128xbf16>
    %cst_16 = arith.constant dense<0.000000e+00> : vector<2x128xf32>
    %16 = tpu.matmul %15, %8, %cst_16 {dimension_numbers = #tpu.dot_dimension_numbers<[1], [0], [0], [1], [0, 0, 1, 1], [], []>} : vector<2x128xbf16>, vector<128x128xbf16>, vector<2x128xf32> -> vector<2x128xf32>
    %17 = vector.extract_strided_slice %7 {offsets = [7, 0, 0], sizes = [1, 2, 128], strides = [1, 1, 1]} : vector<8x2x128xf32> to vector<1x2x128xf32>
    %18 = vector.shape_cast %17 : vector<1x2x128xf32> to vector<2x128xf32>
    %19 = arith.addf %16, %18 : vector<2x128xf32>
    %cst_17 = arith.constant 0.000000e+00 : f32
    %20 = vector.broadcast %cst_17 : f32 to vector<2x128xf32>
    %21 = arith.maximumf %19, %20 : vector<2x128xf32>
    %22 = arith.truncf %21 : vector<2x128xf32> to vector<2x128xbf16>
    %cst_18 = arith.constant dense<0.000000e+00> : vector<2x128xf32>
    %23 = tpu.matmul %22, %9, %cst_18 {dimension_numbers = #tpu.dot_dimension_numbers<[1], [0], [0], [1], [0, 0, 1, 1], [], []>} : vector<2x128xbf16>, vector<128x128xbf16>, vector<2x128xf32> -> vector<2x128xf32>
    %24 = arith.addf %23, %13 : vector<2x128xf32>
    %cst_19 = arith.constant 0.000000e+00 : f32
    %25 = vector.broadcast %cst_19 : f32 to vector<2x128xf32>
    %26 = arith.maximumf %24, %25 : vector<2x128xf32>
    %27 = arith.truncf %26 : vector<2x128xf32> to vector<2x128xbf16>
    %cst_20 = arith.constant dense<0.000000e+00> : vector<2x128xf32>
    %28 = tpu.matmul %27, %10, %cst_20 {dimension_numbers = #tpu.dot_dimension_numbers<[1], [0], [0], [1], [0, 0, 1, 1], [], []>} : vector<2x128xbf16>, vector<128x128xbf16>, vector<2x128xf32> -> vector<2x128xf32>
    %c7 = arith.constant 7 : index
    %29 = memref.load %arg0[%c7] : memref<16xf32, #tpu.memory_space<smem>>
    %30 = vector.broadcast %29 : f32 to vector<2x128xf32>
    %31 = arith.mulf %30, %14 : vector<2x128xf32>
    %c15 = arith.constant 15 : index
    %32 = memref.load %arg0[%c15] : memref<16xf32, #tpu.memory_space<smem>>
    %33 = vector.broadcast %32 : f32 to vector<2x128xf32>
    %34 = arith.mulf %33, %28 : vector<2x128xf32>
    %35 = arith.subf %31, %34 : vector<2x128xf32>
    %c7_21 = arith.constant 7 : index
    %c0_22 = arith.constant 0 : index
    %c0_23 = arith.constant 0 : index
    %36 = vector.load %arg2[%c7_21, %c0_22, %c0_23] : memref<8x2x128xf32, #tpu.memory_space<vmem>>, vector<1x2x128xf32>
    %37 = vector.shape_cast %36 : vector<1x2x128xf32> to vector<2x128xf32>
    %38 = arith.addf %35, %37 : vector<2x128xf32>
    %39 = arith.truncf %38 : vector<2x128xf32> to vector<2x128xbf16>
    %cst_24 = arith.constant dense<0.000000e+00> : vector<2x128xf32>
    %40 = tpu.matmul %39, %8, %cst_24 {dimension_numbers = #tpu.dot_dimension_numbers<[1], [0], [0], [1], [0, 0, 1, 1], [], []>} : vector<2x128xbf16>, vector<128x128xbf16>, vector<2x128xf32> -> vector<2x128xf32>
    %41 = vector.extract_strided_slice %7 {offsets = [6, 0, 0], sizes = [1, 2, 128], strides = [1, 1, 1]} : vector<8x2x128xf32> to vector<1x2x128xf32>
    %42 = vector.shape_cast %41 : vector<1x2x128xf32> to vector<2x128xf32>
    %43 = arith.addf %40, %42 : vector<2x128xf32>
    %cst_25 = arith.constant 0.000000e+00 : f32
    %44 = vector.broadcast %cst_25 : f32 to vector<2x128xf32>
    %45 = arith.maximumf %43, %44 : vector<2x128xf32>
    %46 = arith.truncf %45 : vector<2x128xf32> to vector<2x128xbf16>
    %cst_26 = arith.constant dense<0.000000e+00> : vector<2x128xf32>
    %47 = tpu.matmul %46, %9, %cst_26 {dimension_numbers = #tpu.dot_dimension_numbers<[1], [0], [0], [1], [0, 0, 1, 1], [], []>} : vector<2x128xbf16>, vector<128x128xbf16>, vector<2x128xf32> -> vector<2x128xf32>
    %48 = arith.addf %47, %13 : vector<2x128xf32>
    %cst_27 = arith.constant 0.000000e+00 : f32
    %49 = vector.broadcast %cst_27 : f32 to vector<2x128xf32>
    %50 = arith.maximumf %48, %49 : vector<2x128xf32>
    %51 = arith.truncf %50 : vector<2x128xf32> to vector<2x128xbf16>
    %cst_28 = arith.constant dense<0.000000e+00> : vector<2x128xf32>
    %52 = tpu.matmul %51, %10, %cst_28 {dimension_numbers = #tpu.dot_dimension_numbers<[1], [0], [0], [1], [0, 0, 1, 1], [], []>} : vector<2x128xbf16>, vector<128x128xbf16>, vector<2x128xf32> -> vector<2x128xf32>
    %c6 = arith.constant 6 : index
    %53 = memref.load %arg0[%c6] : memref<16xf32, #tpu.memory_space<smem>>
    %54 = vector.broadcast %53 : f32 to vector<2x128xf32>
    %55 = arith.mulf %54, %38 : vector<2x128xf32>
    %c14 = arith.constant 14 : index
    %56 = memref.load %arg0[%c14] : memref<16xf32, #tpu.memory_space<smem>>
    %57 = vector.broadcast %56 : f32 to vector<2x128xf32>
    %58 = arith.mulf %57, %52 : vector<2x128xf32>
    %59 = arith.subf %55, %58 : vector<2x128xf32>
    %c6_29 = arith.constant 6 : index
    %c0_30 = arith.constant 0 : index
    %c0_31 = arith.constant 0 : index
    %60 = vector.load %arg2[%c6_29, %c0_30, %c0_31] : memref<8x2x128xf32, #tpu.memory_space<vmem>>, vector<1x2x128xf32>
    %61 = vector.shape_cast %60 : vector<1x2x128xf32> to vector<2x128xf32>
    %62 = arith.addf %59, %61 : vector<2x128xf32>
    %63 = arith.truncf %62 : vector<2x128xf32> to vector<2x128xbf16>
    %cst_32 = arith.constant dense<0.000000e+00> : vector<2x128xf32>
    %64 = tpu.matmul %63, %8, %cst_32 {dimension_numbers = #tpu.dot_dimension_numbers<[1], [0], [0], [1], [0, 0, 1, 1], [], []>} : vector<2x128xbf16>, vector<128x128xbf16>, vector<2x128xf32> -> vector<2x128xf32>
    %65 = vector.extract_strided_slice %7 {offsets = [5, 0, 0], sizes = [1, 2, 128], strides = [1, 1, 1]} : vector<8x2x128xf32> to vector<1x2x128xf32>
    %66 = vector.shape_cast %65 : vector<1x2x128xf32> to vector<2x128xf32>
    %67 = arith.addf %64, %66 : vector<2x128xf32>
    %cst_33 = arith.constant 0.000000e+00 : f32
    %68 = vector.broadcast %cst_33 : f32 to vector<2x128xf32>
    %69 = arith.maximumf %67, %68 : vector<2x128xf32>
    %70 = arith.truncf %69 : vector<2x128xf32> to vector<2x128xbf16>
    %cst_34 = arith.constant dense<0.000000e+00> : vector<2x128xf32>
    %71 = tpu.matmul %70, %9, %cst_34 {dimension_numbers = #tpu.dot_dimension_numbers<[1], [0], [0], [1], [0, 0, 1, 1], [], []>} : vector<2x128xbf16>, vector<128x128xbf16>, vector<2x128xf32> -> vector<2x128xf32>
    %72 = arith.addf %71, %13 : vector<2x128xf32>
    %cst_35 = arith.constant 0.000000e+00 : f32
    %73 = vector.broadcast %cst_35 : f32 to vector<2x128xf32>
    %74 = arith.maximumf %72, %73 : vector<2x128xf32>
    %75 = arith.truncf %74 : vector<2x128xf32> to vector<2x128xbf16>
    %cst_36 = arith.constant dense<0.000000e+00> : vector<2x128xf32>
    %76 = tpu.matmul %75, %10, %cst_36 {dimension_numbers = #tpu.dot_dimension_numbers<[1], [0], [0], [1], [0, 0, 1, 1], [], []>} : vector<2x128xbf16>, vector<128x128xbf16>, vector<2x128xf32> -> vector<2x128xf32>
    %c5 = arith.constant 5 : index
    %77 = memref.load %arg0[%c5] : memref<16xf32, #tpu.memory_space<smem>>
    %78 = vector.broadcast %77 : f32 to vector<2x128xf32>
    %79 = arith.mulf %78, %62 : vector<2x128xf32>
    %c13 = arith.constant 13 : index
    %80 = memref.load %arg0[%c13] : memref<16xf32, #tpu.memory_space<smem>>
    %81 = vector.broadcast %80 : f32 to vector<2x128xf32>
    %82 = arith.mulf %81, %76 : vector<2x128xf32>
    %83 = arith.subf %79, %82 : vector<2x128xf32>
    %c5_37 = arith.constant 5 : index
    %c0_38 = arith.constant 0 : index
    %c0_39 = arith.constant 0 : index
    %84 = vector.load %arg2[%c5_37, %c0_38, %c0_39] : memref<8x2x128xf32, #tpu.memory_space<vmem>>, vector<1x2x128xf32>
    %85 = vector.shape_cast %84 : vector<1x2x128xf32> to vector<2x128xf32>
    %86 = arith.addf %83, %85 : vector<2x128xf32>
    %87 = arith.truncf %86 : vector<2x128xf32> to vector<2x128xbf16>
    %cst_40 = arith.constant dense<0.000000e+00> : vector<2x128xf32>
    %88 = tpu.matmul %87, %8, %cst_40 {dimension_numbers = #tpu.dot_dimension_numbers<[1], [0], [0], [1], [0, 0, 1, 1], [], []>} : vector<2x128xbf16>, vector<128x128xbf16>, vector<2x128xf32> -> vector<2x128xf32>
    %89 = vector.extract_strided_slice %7 {offsets = [4, 0, 0], sizes = [1, 2, 128], strides = [1, 1, 1]} : vector<8x2x128xf32> to vector<1x2x128xf32>
    %90 = vector.shape_cast %89 : vector<1x2x128xf32> to vector<2x128xf32>
    %91 = arith.addf %88, %90 : vector<2x128xf32>
    %cst_41 = arith.constant 0.000000e+00 : f32
    %92 = vector.broadcast %cst_41 : f32 to vector<2x128xf32>
    %93 = arith.maximumf %91, %92 : vector<2x128xf32>
    %94 = arith.truncf %93 : vector<2x128xf32> to vector<2x128xbf16>
    %cst_42 = arith.constant dense<0.000000e+00> : vector<2x128xf32>
    %95 = tpu.matmul %94, %9, %cst_42 {dimension_numbers = #tpu.dot_dimension_numbers<[1], [0], [0], [1], [0, 0, 1, 1], [], []>} : vector<2x128xbf16>, vector<128x128xbf16>, vector<2x128xf32> -> vector<2x128xf32>
    %96 = arith.addf %95, %13 : vector<2x128xf32>
    %cst_43 = arith.constant 0.000000e+00 : f32
    %97 = vector.broadcast %cst_43 : f32 to vector<2x128xf32>
    %98 = arith.maximumf %96, %97 : vector<2x128xf32>
    %99 = arith.truncf %98 : vector<2x128xf32> to vector<2x128xbf16>
    %cst_44 = arith.constant dense<0.000000e+00> : vector<2x128xf32>
    %100 = tpu.matmul %99, %10, %cst_44 {dimension_numbers = #tpu.dot_dimension_numbers<[1], [0], [0], [1], [0, 0, 1, 1], [], []>} : vector<2x128xbf16>, vector<128x128xbf16>, vector<2x128xf32> -> vector<2x128xf32>
    %c4 = arith.constant 4 : index
    %101 = memref.load %arg0[%c4] : memref<16xf32, #tpu.memory_space<smem>>
    %102 = vector.broadcast %101 : f32 to vector<2x128xf32>
    %103 = arith.mulf %102, %86 : vector<2x128xf32>
    %c12 = arith.constant 12 : index
    %104 = memref.load %arg0[%c12] : memref<16xf32, #tpu.memory_space<smem>>
    %105 = vector.broadcast %104 : f32 to vector<2x128xf32>
    %106 = arith.mulf %105, %100 : vector<2x128xf32>
    %107 = arith.subf %103, %106 : vector<2x128xf32>
    %c4_45 = arith.constant 4 : index
    %c0_46 = arith.constant 0 : index
    %c0_47 = arith.constant 0 : index
    %108 = vector.load %arg2[%c4_45, %c0_46, %c0_47] : memref<8x2x128xf32, #tpu.memory_space<vmem>>, vector<1x2x128xf32>
    %109 = vector.shape_cast %108 : vector<1x2x128xf32> to vector<2x128xf32>
    %110 = arith.addf %107, %109 : vector<2x128xf32>
    %111 = arith.truncf %110 : vector<2x128xf32> to vector<2x128xbf16>
    %cst_48 = arith.constant dense<0.000000e+00> : vector<2x128xf32>
    %112 = tpu.matmul %111, %8, %cst_48 {dimension_numbers = #tpu.dot_dimension_numbers<[1], [0], [0], [1], [0, 0, 1, 1], [], []>} : vector<2x128xbf16>, vector<128x128xbf16>, vector<2x128xf32> -> vector<2x128xf32>
    %113 = vector.extract_strided_slice %7 {offsets = [3, 0, 0], sizes = [1, 2, 128], strides = [1, 1, 1]} : vector<8x2x128xf32> to vector<1x2x128xf32>
    %114 = vector.shape_cast %113 : vector<1x2x128xf32> to vector<2x128xf32>
    %115 = arith.addf %112, %114 : vector<2x128xf32>
    %cst_49 = arith.constant 0.000000e+00 : f32
    %116 = vector.broadcast %cst_49 : f32 to vector<2x128xf32>
    %117 = arith.maximumf %115, %116 : vector<2x128xf32>
    %118 = arith.truncf %117 : vector<2x128xf32> to vector<2x128xbf16>
    %cst_50 = arith.constant dense<0.000000e+00> : vector<2x128xf32>
    %119 = tpu.matmul %118, %9, %cst_50 {dimension_numbers = #tpu.dot_dimension_numbers<[1], [0], [0], [1], [0, 0, 1, 1], [], []>} : vector<2x128xbf16>, vector<128x128xbf16>, vector<2x128xf32> -> vector<2x128xf32>
    %120 = arith.addf %119, %13 : vector<2x128xf32>
    %cst_51 = arith.constant 0.000000e+00 : f32
    %121 = vector.broadcast %cst_51 : f32 to vector<2x128xf32>
    %122 = arith.maximumf %120, %121 : vector<2x128xf32>
    %123 = arith.truncf %122 : vector<2x128xf32> to vector<2x128xbf16>
    %cst_52 = arith.constant dense<0.000000e+00> : vector<2x128xf32>
    %124 = tpu.matmul %123, %10, %cst_52 {dimension_numbers = #tpu.dot_dimension_numbers<[1], [0], [0], [1], [0, 0, 1, 1], [], []>} : vector<2x128xbf16>, vector<128x128xbf16>, vector<2x128xf32> -> vector<2x128xf32>
    %c3 = arith.constant 3 : index
    %125 = memref.load %arg0[%c3] : memref<16xf32, #tpu.memory_space<smem>>
    %126 = vector.broadcast %125 : f32 to vector<2x128xf32>
    %127 = arith.mulf %126, %110 : vector<2x128xf32>
    %c11 = arith.constant 11 : index
    %128 = memref.load %arg0[%c11] : memref<16xf32, #tpu.memory_space<smem>>
    %129 = vector.broadcast %128 : f32 to vector<2x128xf32>
    %130 = arith.mulf %129, %124 : vector<2x128xf32>
    %131 = arith.subf %127, %130 : vector<2x128xf32>
    %c3_53 = arith.constant 3 : index
    %c0_54 = arith.constant 0 : index
    %c0_55 = arith.constant 0 : index
    %132 = vector.load %arg2[%c3_53, %c0_54, %c0_55] : memref<8x2x128xf32, #tpu.memory_space<vmem>>, vector<1x2x128xf32>
    %133 = vector.shape_cast %132 : vector<1x2x128xf32> to vector<2x128xf32>
    %134 = arith.addf %131, %133 : vector<2x128xf32>
    %135 = arith.truncf %134 : vector<2x128xf32> to vector<2x128xbf16>
    %cst_56 = arith.constant dense<0.000000e+00> : vector<2x128xf32>
    %136 = tpu.matmul %135, %8, %cst_56 {dimension_numbers = #tpu.dot_dimension_numbers<[1], [0], [0], [1], [0, 0, 1, 1], [], []>} : vector<2x128xbf16>, vector<128x128xbf16>, vector<2x128xf32> -> vector<2x128xf32>
    %137 = vector.extract_strided_slice %7 {offsets = [2, 0, 0], sizes = [1, 2, 128], strides = [1, 1, 1]} : vector<8x2x128xf32> to vector<1x2x128xf32>
    %138 = vector.shape_cast %137 : vector<1x2x128xf32> to vector<2x128xf32>
    %139 = arith.addf %136, %138 : vector<2x128xf32>
    %cst_57 = arith.constant 0.000000e+00 : f32
    %140 = vector.broadcast %cst_57 : f32 to vector<2x128xf32>
    %141 = arith.maximumf %139, %140 : vector<2x128xf32>
    %142 = arith.truncf %141 : vector<2x128xf32> to vector<2x128xbf16>
    %cst_58 = arith.constant dense<0.000000e+00> : vector<2x128xf32>
    %143 = tpu.matmul %142, %9, %cst_58 {dimension_numbers = #tpu.dot_dimension_numbers<[1], [0], [0], [1], [0, 0, 1, 1], [], []>} : vector<2x128xbf16>, vector<128x128xbf16>, vector<2x128xf32> -> vector<2x128xf32>
    %144 = arith.addf %143, %13 : vector<2x128xf32>
    %cst_59 = arith.constant 0.000000e+00 : f32
    %145 = vector.broadcast %cst_59 : f32 to vector<2x128xf32>
    %146 = arith.maximumf %144, %145 : vector<2x128xf32>
    %147 = arith.truncf %146 : vector<2x128xf32> to vector<2x128xbf16>
    %cst_60 = arith.constant dense<0.000000e+00> : vector<2x128xf32>
    %148 = tpu.matmul %147, %10, %cst_60 {dimension_numbers = #tpu.dot_dimension_numbers<[1], [0], [0], [1], [0, 0, 1, 1], [], []>} : vector<2x128xbf16>, vector<128x128xbf16>, vector<2x128xf32> -> vector<2x128xf32>
    %c2 = arith.constant 2 : index
    %149 = memref.load %arg0[%c2] : memref<16xf32, #tpu.memory_space<smem>>
    %150 = vector.broadcast %149 : f32 to vector<2x128xf32>
    %151 = arith.mulf %150, %134 : vector<2x128xf32>
    %c10 = arith.constant 10 : index
    %152 = memref.load %arg0[%c10] : memref<16xf32, #tpu.memory_space<smem>>
    %153 = vector.broadcast %152 : f32 to vector<2x128xf32>
    %154 = arith.mulf %153, %148 : vector<2x128xf32>
    %155 = arith.subf %151, %154 : vector<2x128xf32>
    %c2_61 = arith.constant 2 : index
    %c0_62 = arith.constant 0 : index
    %c0_63 = arith.constant 0 : index
    %156 = vector.load %arg2[%c2_61, %c0_62, %c0_63] : memref<8x2x128xf32, #tpu.memory_space<vmem>>, vector<1x2x128xf32>
    %157 = vector.shape_cast %156 : vector<1x2x128xf32> to vector<2x128xf32>
    %158 = arith.addf %155, %157 : vector<2x128xf32>
    %159 = arith.truncf %158 : vector<2x128xf32> to vector<2x128xbf16>
    %cst_64 = arith.constant dense<0.000000e+00> : vector<2x128xf32>
    %160 = tpu.matmul %159, %8, %cst_64 {dimension_numbers = #tpu.dot_dimension_numbers<[1], [0], [0], [1], [0, 0, 1, 1], [], []>} : vector<2x128xbf16>, vector<128x128xbf16>, vector<2x128xf32> -> vector<2x128xf32>
    %161 = vector.extract_strided_slice %7 {offsets = [1, 0, 0], sizes = [1, 2, 128], strides = [1, 1, 1]} : vector<8x2x128xf32> to vector<1x2x128xf32>
    %162 = vector.shape_cast %161 : vector<1x2x128xf32> to vector<2x128xf32>
    %163 = arith.addf %160, %162 : vector<2x128xf32>
    %cst_65 = arith.constant 0.000000e+00 : f32
    %164 = vector.broadcast %cst_65 : f32 to vector<2x128xf32>
    %165 = arith.maximumf %163, %164 : vector<2x128xf32>
    %166 = arith.truncf %165 : vector<2x128xf32> to vector<2x128xbf16>
    %cst_66 = arith.constant dense<0.000000e+00> : vector<2x128xf32>
    %167 = tpu.matmul %166, %9, %cst_66 {dimension_numbers = #tpu.dot_dimension_numbers<[1], [0], [0], [1], [0, 0, 1, 1], [], []>} : vector<2x128xbf16>, vector<128x128xbf16>, vector<2x128xf32> -> vector<2x128xf32>
    %168 = arith.addf %167, %13 : vector<2x128xf32>
    %cst_67 = arith.constant 0.000000e+00 : f32
    %169 = vector.broadcast %cst_67 : f32 to vector<2x128xf32>
    %170 = arith.maximumf %168, %169 : vector<2x128xf32>
    %171 = arith.truncf %170 : vector<2x128xf32> to vector<2x128xbf16>
    %cst_68 = arith.constant dense<0.000000e+00> : vector<2x128xf32>
    %172 = tpu.matmul %171, %10, %cst_68 {dimension_numbers = #tpu.dot_dimension_numbers<[1], [0], [0], [1], [0, 0, 1, 1], [], []>} : vector<2x128xbf16>, vector<128x128xbf16>, vector<2x128xf32> -> vector<2x128xf32>
    %c1 = arith.constant 1 : index
    %173 = memref.load %arg0[%c1] : memref<16xf32, #tpu.memory_space<smem>>
    %174 = vector.broadcast %173 : f32 to vector<2x128xf32>
    %175 = arith.mulf %174, %158 : vector<2x128xf32>
    %c9 = arith.constant 9 : index
    %176 = memref.load %arg0[%c9] : memref<16xf32, #tpu.memory_space<smem>>
    %177 = vector.broadcast %176 : f32 to vector<2x128xf32>
    %178 = arith.mulf %177, %172 : vector<2x128xf32>
    %179 = arith.subf %175, %178 : vector<2x128xf32>
    %c1_69 = arith.constant 1 : index
    %c0_70 = arith.constant 0 : index
    %c0_71 = arith.constant 0 : index
    %180 = vector.load %arg2[%c1_69, %c0_70, %c0_71] : memref<8x2x128xf32, #tpu.memory_space<vmem>>, vector<1x2x128xf32>
    %181 = vector.shape_cast %180 : vector<1x2x128xf32> to vector<2x128xf32>
    %182 = arith.addf %179, %181 : vector<2x128xf32>
    %183 = arith.truncf %182 : vector<2x128xf32> to vector<2x128xbf16>
    %cst_72 = arith.constant dense<0.000000e+00> : vector<2x128xf32>
    %184 = tpu.matmul %183, %8, %cst_72 {dimension_numbers = #tpu.dot_dimension_numbers<[1], [0], [0], [1], [0, 0, 1, 1], [], []>} : vector<2x128xbf16>, vector<128x128xbf16>, vector<2x128xf32> -> vector<2x128xf32>
    %185 = vector.extract_strided_slice %7 {offsets = [0, 0, 0], sizes = [1, 2, 128], strides = [1, 1, 1]} : vector<8x2x128xf32> to vector<1x2x128xf32>
    %186 = vector.shape_cast %185 : vector<1x2x128xf32> to vector<2x128xf32>
    %187 = arith.addf %184, %186 : vector<2x128xf32>
    %cst_73 = arith.constant 0.000000e+00 : f32
    %188 = vector.broadcast %cst_73 : f32 to vector<2x128xf32>
    %189 = arith.maximumf %187, %188 : vector<2x128xf32>
    %190 = arith.truncf %189 : vector<2x128xf32> to vector<2x128xbf16>
    %cst_74 = arith.constant dense<0.000000e+00> : vector<2x128xf32>
    %191 = tpu.matmul %190, %9, %cst_74 {dimension_numbers = #tpu.dot_dimension_numbers<[1], [0], [0], [1], [0, 0, 1, 1], [], []>} : vector<2x128xbf16>, vector<128x128xbf16>, vector<2x128xf32> -> vector<2x128xf32>
    %192 = arith.addf %191, %13 : vector<2x128xf32>
    %cst_75 = arith.constant 0.000000e+00 : f32
    %193 = vector.broadcast %cst_75 : f32 to vector<2x128xf32>
    %194 = arith.maximumf %192, %193 : vector<2x128xf32>
    %195 = arith.truncf %194 : vector<2x128xf32> to vector<2x128xbf16>
    %cst_76 = arith.constant dense<0.000000e+00> : vector<2x128xf32>
    %196 = tpu.matmul %195, %10, %cst_76 {dimension_numbers = #tpu.dot_dimension_numbers<[1], [0], [0], [1], [0, 0, 1, 1], [], []>} : vector<2x128xbf16>, vector<128x128xbf16>, vector<2x128xf32> -> vector<2x128xf32>
    %c0_77 = arith.constant 0 : index
    %197 = memref.load %arg0[%c0_77] : memref<16xf32, #tpu.memory_space<smem>>
    %198 = vector.broadcast %197 : f32 to vector<2x128xf32>
    %199 = arith.mulf %198, %182 : vector<2x128xf32>
    %c8 = arith.constant 8 : index
    %200 = memref.load %arg0[%c8] : memref<16xf32, #tpu.memory_space<smem>>
    %201 = vector.broadcast %200 : f32 to vector<2x128xf32>
    %202 = arith.mulf %201, %196 : vector<2x128xf32>
    %203 = arith.subf %199, %202 : vector<2x128xf32>
    %c0_78 = arith.constant 0 : index
    %c0_79 = arith.constant 0 : index
    %c0_80 = arith.constant 0 : index
    %204 = vector.load %arg2[%c0_78, %c0_79, %c0_80] : memref<8x2x128xf32, #tpu.memory_space<vmem>>, vector<1x2x128xf32>
    %205 = vector.shape_cast %204 : vector<1x2x128xf32> to vector<2x128xf32>
    %206 = arith.addf %203, %205 : vector<2x128xf32>
    %c0_81 = arith.constant 0 : index
    %c0_82 = arith.constant 0 : index
    %207 = vector.load %arg10[%c0_81, %c0_82] : memref<2x128xf32, #tpu.memory_space<vmem>>, vector<2x128xf32>
    tpu.vector_store %arg10[%c0_81, %c0_82], %206 {strides = array<i32>} : memref<2x128xf32, #tpu.memory_space<vmem>>, vector<2x128xf32>,
    return
  }
}

</mosaic_0001>

<bundles_post_ra>
// kernel: tpu_custom_call.1
= control target key start
LH: loop header
LB: loop body
LE: loop exit
PB: predicated region body
PF: predicated region fallthrough
CT: control target
= control target key end

     0   :  { %15 = vsyncpa [#allocation5], 0  ;;  %s3335_s0 = inlined_call_operand.vmem [shape: f32[16], index: 0, kind: input, shape index: {}]   ;;  %s3336_s1 = inlined_call_operand.hbm [shape: f32[2,128], index: 1, kind: input, shape index: {}, may-alias: {1,10}]   ;;  %s3337_s2 = inlined_call_operand.vmem [shape: f32[8,2,128], index: 2, kind: input, shape index: {}]   ;;  %s3338_s3 = inlined_call_operand.hbm [shape: bf16[2,128], index: 3, kind: input, shape index: {}]   ;;  %s3339_s4 = inlined_call_operand.hbm [shape: f32[8,2,128], index: 4, kind: input, shape index: {}]   ;;  %s3340_s5 = inlined_call_operand.hbm [shape: bf16[128,128], index: 5, kind: input, shape index: {}]   ;;  %s3341_s6 = inlined_call_operand.hbm [shape: bf16[128,128], index: 6, kind: input, shape index: {}]   ;;  %s3342_s7 = inlined_call_operand.hbm [shape: bf16[128,128], index: 7, kind: input, shape index: {}]   ;;  %s3343_s8 = inlined_call_operand.hbm [shape: bf16[128,128], index: 8, kind: input, shape index: {}]   ;;  %s3344_s9 = inlined_call_operand.hbm [shape: f32[1,128], index: 9, kind: input, shape index: {}]   ;;  %s3345_s10 = inlined_call_operand.hbm [shape: f32[2,128], index: 10, kind: output, shape index: {}, may-alias: {1,10}]  }
   0x1   :  { %16 = vsyncpa [#allocation3], 0 }
   0x2   :  { %17 = vsyncpa [#allocation8], 0 }
   0x3   :  { %18 = vsyncpa [#allocation11], 0 }
   0x4   :  { %19 = vsyncpa [#allocation14], 0 }
   0x5   :  { %20 = vsyncpa [#allocation17], 0 }
   0x6   :  { %21 = vsyncpa [#allocation4], 0  ;;  %s2633_s13 = smov [#allocation7]   ;;  %s2634_s15 = smov [#allocation10]  }
   0x7   :  { %s50_s14 = sshll.u32 %s2633_s13, 4  ;;  %s71_s16 = sshll.u32 %s2634_s15, 4  ;;  %s51_s14 = int_to_ptr.vmem [resolvable:$true] %s50_s14  ;;  %s72_s16 = int_to_ptr.vmem [resolvable:$true] %s71_s16 }
   0x8   :  { %s2435_s17 = scalar_lea.vmem %s51_s14, 16  ;;  %s2439_s18 = scalar_lea.vmem %s51_s14, 32 }
   0x9   :  { %p2436_p0 = scmp.ne.s32.totalorder %s51_s14, %s2435_s17  ;;  %p2440_p1 = scmp.lt.s32.totalorder %s51_s14, %s51_s14 }
   0xa   :  { %p2441_p2 = scmp.lt.s32.totalorder %s2439_s18, %s2435_s17 }
   0xc   :  { %p2442_p3 = por %p2441_p2, %p2440_p1 }
   0xe   :  { %p2443_p4 = pnand %p2442_p3, %p2436_p0 }
  0x10   :  { %2446 = shalt.err (!%p2443_p4)
}
  0x11   :  { %53 = dma.hbm_to_vmem [thread:$0]  %s3338_s3, 16, %s51_s14, [#allocation8]  }
  0x12   :  { %s2455_s21 = scalar_lea.vmem %s72_s16, 1024  ;;  %p2460_p6 = scmp.lt.s32.totalorder %s72_s16, %s72_s16 }
  0x13   :  { %p2456_p5 = scmp.ne.s32.totalorder %s72_s16, %s2455_s21  ;;  %p2461_p7 = scmp.lt.s32.totalorder %s2455_s21, %s2455_s21 }
  0x15   :  { %p2462_p8 = por %p2461_p7, %p2460_p6 }
  0x17   :  { %p2463_p9 = pnand %p2462_p8, %p2456_p5 }
  0x19   :  { %2466 = shalt.err (!%p2463_p9)
}
  0x1a   :  { %s2635_s22 = smov 64   ;;  %s2636_s23 = smov 4  }
  0x1b   :  { %77 = dma.hbm_to_vmem [thread:$0]  %s3340_s5, 1024, %s72_s16, [#allocation11], %s2635_s22, %s2635_s22, %s2636_s23  }
  0x1c   :  { %s28_s3 = sshll.u32 %s3335_s0, 4  ;;  %s2637_s28 = smov [#allocation13]   ;;  %s29_s3 = int_to_ptr.vmem [resolvable:$true] %s28_s3 }
  0x1d   :  { %s95_s29 = sshll.u32 %s2637_s28, 4  ;;  %s96_s29 = int_to_ptr.vmem [resolvable:$true] %s95_s29 }
  0x1e   :  { %s2475_s30 = scalar_lea.vmem %s96_s29, 1024  ;;  %p2480_p11 = scmp.lt.s32.totalorder %s96_s29, %s96_s29 }
  0x1f   :  { %p2476_p10 = scmp.ne.s32.totalorder %s96_s29, %s2475_s30  ;;  %p2481_p12 = scmp.lt.s32.totalorder %s2475_s30, %s2475_s30 }
  0x21   :  { %p2482_p13 = por %p2481_p12, %p2480_p11 }
  0x23   :  { %p2483_p0 = pnand %p2482_p13, %p2476_p10 }
  0x25   :  { %2486 = shalt.err (!%p2483_p0)
}
  0x26   :  { %101 = dma.hbm_to_vmem [thread:$0]  %s3342_s7, 1024, %s96_s29, [#allocation14], %s2635_s22, %s2635_s22, %s2636_s23  }
  0x27   :  { %s2487_s12 = scalar_lea.vmem %s29_s3, 16  ;;  %p2492_p2 = scmp.lt.s32.totalorder %s29_s3, %s29_s3 }
  0x28   :  { %p2488_p1 = scmp.ne.s32.totalorder %s29_s3, %s2487_s12  ;;  %p2493_p3 = scmp.lt.s32.totalorder %s2487_s12, %s2487_s12 }
  0x2a   :  { %p2494_p4 = por %p2493_p3, %p2492_p2 }
  0x2c   :  { %p2495_p5 = pnand %p2494_p4, %p2488_p1 }
  0x2e   :  { %2498 = shalt.err (!%p2495_p5)
}
  0x2f   :  { %s2638_s0 = smov [#allocation2]   ;;  %s2639_s13 = smov [#allocation6]  }
  0x30   :  { %31 = dma.vmem_to_smem %s29_s3, 16, %s2638_s0, [#allocation5]  }
  0x31   :  { %s38_s14 = sshll.u32 %s2639_s13, 4  ;;  %s2640_s15 = smov [#allocation9]   ;;  %s39_s14 = int_to_ptr.vmem [resolvable:$true] %s38_s14 }
  0x32   :  { %s59_s16 = sshll.u32 %s2640_s15, 4  ;;  %s2507_s17 = scalar_lea.vmem %s39_s14, 32  ;;  %s60_s16 = int_to_ptr.vmem [resolvable:$true] %s59_s16 }
  0x33   :  { %p2508_p6 = scmp.ne.s32.totalorder %s39_s14, %s2507_s17  ;;  %p2512_p7 = scmp.lt.s32.totalorder %s39_s14, %s39_s14 }
  0x34   :  { %p2513_p8 = scmp.lt.s32.totalorder %s2507_s17, %s2507_s17 }
  0x36   :  { %p2514_p9 = por %p2513_p8, %p2512_p7 }
  0x38   :  { %p2515_p10 = pnand %p2514_p9, %p2508_p6 }
  0x3a   :  { %2518 = shalt.err (!%p2515_p10)
}
  0x3b   :  { %41 = dma.hbm_to_vmem [thread:$0]  %s3336_s1, 32, %s39_s14, [#allocation3]  }
  0x3c   :  { %s2527_s19 = scalar_lea.vmem %s60_s16, 256  ;;  %p2532_p12 = scmp.lt.s32.totalorder %s60_s16, %s60_s16 }
  0x3d   :  { %p2528_p11 = scmp.ne.s32.totalorder %s60_s16, %s2527_s19  ;;  %p2533_p13 = scmp.lt.s32.totalorder %s2527_s19, %s2527_s19 }
  0x3f   :  { %p2534_p0 = por %p2533_p13, %p2532_p12 }
  0x41   :  { %p2535_p1 = pnand %p2534_p0, %p2528_p11 }
  0x43   :  { %2538 = shalt.err (!%p2535_p1)
}
  0x44   :  { %s2641_s20 = smov 32   ;;  %s2642_s21 = smov 2  }
  0x45   :  { %65 = dma.hbm_to_vmem [thread:$0]  %s3339_s4, 256, %s60_s16, [#allocation8], %s2641_s20, %s2641_s20, %s2642_s21  }
  0x46   :  { %s2643_s26 = smov [#allocation12]   ;;  %s2644_s3 = smov [#allocation15]  }
  0x47   :  { %s83_s27 = sshll.u32 %s2643_s26, 4  ;;  %s107_s28 = sshll.u32 %s2644_s3, 4  ;;  %s84_s27 = int_to_ptr.vmem [resolvable:$true] %s83_s27  ;;  %s108_s28 = int_to_ptr.vmem [resolvable:$true] %s107_s28 }
  0x48   :  { %s2547_s1 = scalar_lea.vmem %s84_s27, 1024  ;;  %p2552_p3 = scmp.lt.s32.totalorder %s84_s27, %s84_s27 }
  0x49   :  { %p2548_p2 = scmp.ne.s32.totalorder %s84_s27, %s2547_s1  ;;  %p2553_p4 = scmp.lt.s32.totalorder %s2547_s1, %s2547_s1 }
  0x4b   :  { %p2554_p5 = por %p2553_p4, %p2552_p3 }
  0x4d   :  { %p2555_p6 = pnand %p2554_p5, %p2548_p2 }
  0x4f   :  { %2558 = shalt.err (!%p2555_p6)
}
  0x50   :  { %89 = dma.hbm_to_vmem [thread:$0]  %s3341_s6, 1024, %s84_s27, [#allocation11], %s2635_s22, %s2635_s22, %s2636_s23  }
  0x51   :  { %s2567_s4 = scalar_lea.vmem %s108_s28, 1024  ;;  %p2572_p8 = scmp.lt.s32.totalorder %s108_s28, %s108_s28 }
  0x52   :  { %p2568_p7 = scmp.ne.s32.totalorder %s108_s28, %s2567_s4  ;;  %p2573_p9 = scmp.lt.s32.totalorder %s2567_s4, %s2567_s4 }
  0x54   :  { %p2574_p10 = por %p2573_p9, %p2572_p8 }
  0x56   :  { %p2575_p11 = pnand %p2574_p10, %p2568_p7 }
  0x58   :  { %2578 = shalt.err (!%p2575_p11)
}
  0x59   :  { %113 = dma.hbm_to_vmem [thread:$0]  %s3343_s8, 1024, %s108_s28, [#allocation14], %s2635_s22, %s2635_s22, %s2636_s23  }
  0x5a   :  { %s2645_s12 = smov [#allocation16]  }
  0x5b   :  { %s120_s0 = sshll.u32 %s2645_s12, 4  ;;  %s121_s0 = int_to_ptr.vmem [resolvable:$true] %s120_s0 }
  0x5c   :  { %s2587_s13 = scalar_lea.vmem %s121_s0, 16  ;;  %s2591_s6 = scalar_lea.vmem %s121_s0, 32 }
  0x5d   :  { %p2588_p12 = scmp.ne.s32.totalorder %s121_s0, %s2587_s13  ;;  %p2592_p13 = scmp.lt.s32.totalorder %s121_s0, %s121_s0 }
  0x5e   :  { %p2593_p0 = scmp.lt.s32.totalorder %s2591_s6, %s2587_s13 }
  0x60   :  { %p2594_p1 = por %p2593_p0, %p2592_p13 }
  0x62   :  { %p2595_p2 = pnand %p2594_p1, %p2588_p12 }
  0x64   :  { %2598 = shalt.err (!%p2595_p2)
}
  0x65   :  { %123 = dma.hbm_to_vmem [thread:$0]  %s3344_s9, 16, %s121_s0, [#allocation17]  }
  0x66   :  { %2619 = dma.done.wait [#allocation5], 16  }
  0x67   :  { %2620 = vsyncadd [#allocation5], 4294967280 }
  0x68   :  { %2621 = dma.done.wait [#allocation3], 32  }
  0x69   :  { %2622 = vsyncadd [#allocation3], 4294967264 }
  0x6a   :  { %2623 = dma.done.wait [#allocation8], 272  }
  0x6b   :  { %2624 = vsyncadd [#allocation8], 4294967024 }
  0x6c   :  { %2625 = dma.done.wait [#allocation11], 2048  }
  0x6d   :  { %2626 = vsyncadd [#allocation11], 4294965248 }
  0x6e   :  { %2627 = dma.done.wait [#allocation14], 2048  }
  0x6f   :  { %2628 = vsyncadd [#allocation14], 4294965248 }
  0x70   :  { %2629 = dma.done.wait [#allocation17], 16  }
  0x71   :  { %2630 = vsyncadd [#allocation17], 4294967280 }
  0x72   :  { %151 = sfence }
  0x73   :  { %v2370_v0 = vld [vmem:[#allocation10 + $0x38] sm:$0xff]   ;;  %v2646_v1 = vmov 0.0   ;;  %v2372_v3 = vld [vmem:[#allocation10 + $0x30] sm:$0xff]   ;;  %vm2647_vm0 = vmmov 0   ;;  %v2374_v5 = vld [vmem:[#allocation10 + $0x28] sm:$0xff]   ;;  %s1607_s8 = sld [smem:[#allocation2 + $0x7]] }
  0x74   :  { %1854 = vmatprep.subr.bf16.mxu0 %v2646_v1  ;;  %1874 = vmatprep.subr.bf16.mxu1 %v2646_v1  ;;  %v2745_v2 = vld [vmem:[#allocation12 + $0x38] sm:$0xff]   ;;  %v2751_v4 = vld [vmem:[#allocation12 + $0x30] sm:$0xff]   ;;  %v2758_v6 = vld [vmem:[#allocation12 + $0x28] sm:$0xff]   ;;  %s1608_s9 = sld [smem:[#allocation2 + $0xf]]  ;;  %s2648_s23 = smov [#allocation18]  }
  0x75   :  { %1855 = vmatpush3.bf16.msra.mxu0 %v2370_v0  ;;  %1870 = vmatprep.mubr.msk.bf16.mxu0 %vm2647_vm0, %v2646_v1  ;;  %v2376_v7 = vld [vmem:[#allocation10 + $0x20] sm:$0xff]   ;;  %v2378_v9 = vld [vmem:[#allocation10 + $0x18] sm:$0xff]   ;;  %v2380_v11 = vld [vmem:[#allocation10 + $0x10] sm:$0xff]   ;;  %s1610_s16 = sld [smem:[#allocation2 + $0x6]] }
  0x76   :  { %1875 = vmatpush3.bf16.msra.mxu1 %v2745_v2  ;;  %1856 = vmatprep.subr.bf16.mxu0 %v2646_v1  ;;  %v2763_v8 = vld [vmem:[#allocation12 + $0x20] sm:$0xff]   ;;  %v2768_v10 = vld [vmem:[#allocation12 + $0x18] sm:$0xff]   ;;  %v2773_v12 = vld [vmem:[#allocation12 + $0x10] sm:$0xff]   ;;  %s1611_s17 = sld [smem:[#allocation2 + $0xe]] }
  0x77   :  { %1876 = vmatprep.subr.bf16.mxu1 %v2646_v1  ;;  %1890 = vmatprep.mubr.msk.bf16.mxu1 %vm2647_vm0, %v2646_v1  ;;  %v2382_v13 = vld [vmem:[#allocation10 + $0x8] sm:$0xff]   ;;  %v2384_v15 = vld [vmem:[#allocation10] sm:$0xff]   ;;  %v2790_v20 = vld [vmem:[#allocation13 + $0x38] sm:$0xff]   ;;  %s1613_s19 = sld [smem:[#allocation2 + $0x5]] }
  0x78   :  { %v2776_v14 = vld [vmem:[#allocation12 + $0x8] sm:$0xff]   ;;  %v2781_v16 = vld [vmem:[#allocation12] sm:$0xff]   ;;  %v2796_v21 = vld [vmem:[#allocation13 + $0x30] sm:$0xff]   ;;  %s1614_s20 = sld [smem:[#allocation2 + $0xd]] }
  0x79   :  { %1857 = vmatpush3.bf16.msra.mxu0 %v2372_v3  ;;  %v2783_v17 = vld [vmem:[#allocation6] sm:$0x3]  ;;  %v153_v18 = vld [vmem:[#allocation7] sm:$0x1]  ;;  %v2808_v23 = vld [vmem:[#allocation13 + $0x20] sm:$0xff]   ;;  %v600_v57 = vstv %s1607_s8  ;;  %s1616_s25 = sld [smem:[#allocation2 + $0x4]] }
  0x7a   :  { %1877 = vmatpush3.bf16.msra.mxu1 %v2751_v4  ;;  %1858 = vmatprep.subr.bf16.mxu0 %v2646_v1  ;;  %v330_v19 = vpack.c.bf16 %v2783_v17, %v2783_v17  ;;  %v2804_v22 = vld [vmem:[#allocation13 + $0x28] sm:$0xff]   ;;  %v2812_v24 = vld [vmem:[#allocation13 + $0x18] sm:$0xff]   ;;  %v2816_v25 = vld [vmem:[#allocation13 + $0x10] sm:$0xff]   ;;  %v603_v58 = vstv %s1608_s9  ;;  %v601_v59 = vmul.f32 %v600_v57, %v2783_v17  ;;  %s1617_s26 = sld [smem:[#allocation2 + $0xc]] }
  0x7b   :  { %1878 = vmatprep.subr.bf16.mxu1 %v2646_v1  ;;  %v2821_v26 = vld [vmem:[#allocation13 + $0x8] sm:$0xff]   ;;  %v2825_v27 = vld [vmem:[#allocation13] sm:$0xff]   ;;  %v2829_v28 = vld [vmem:[#allocation15 + $0x38] sm:$0xff]   ;;  %s1619_s28 = sld [smem:[#allocation2 + $0x3]] }
  0x7c   :  { %v2832_v29 = vld [vmem:[#allocation15 + $0x30] sm:$0xff]   ;;  %v2836_v30 = vld [vmem:[#allocation15 + $0x28] sm:$0xff]   ;;  %v2840_v31 = vld [vmem:[#allocation15 + $0x20] sm:$0xff]   ;;  %s1620_s1 = sld [smem:[#allocation2 + $0xb]] }
  0x7d   :  { %1859 = vmatpush3.bf16.msra.mxu0 %v2374_v5  ;;  %v2844_v32 = vld [vmem:[#allocation15 + $0x18] sm:$0xff]   ;;  %v2848_v33 = vld [vmem:[#allocation15 + $0x10] sm:$0xff]   ;;  %v2874_v47 = vld [vmem:[#allocation15 + $0x8] sm:$0xff]   ;;  %s1622_s4 = sld [smem:[#allocation2 + $0x2]] }
  0x7e   :  { %1879 = vmatpush3.bf16.msra.mxu1 %v2758_v6  ;;  %1860 = vmatprep.subr.bf16.mxu0 %v2646_v1  ;;  %v265_v34 = vld [vmem:[#allocation9 + $0xe] sm:$0x3]  ;;  %v2878_v48 = vld [vmem:[#allocation15] sm:$0xff]   ;;  %v1609_v62 = vld [vmem:[%s3337_s2 + $0xe] sm:$0x3]  ;;  %s1623_s11 = sld [smem:[#allocation2 + $0xa]] }
  0x7f   :  { %1880 = vmatprep.subr.bf16.mxu1 %v2646_v1  ;;  %v2882_v49 = vld [vmem:[#allocation16] ss:$0 sm:$0xff]  ;;  %s1625_s0 = sld [smem:[#allocation2 + $0x1]] }
  0x80   :  { %s1626_s13 = sld [smem:[#allocation2 + $0x9]] }
  0x81   :  { %1861 = vmatpush3.bf16.msra.mxu0 %v2376_v7  ;;  %s1544_s15 = sld [smem:[#allocation2]] }
  0x82   :  { %1881 = vmatpush3.bf16.msra.mxu1 %v2763_v8  ;;  %1862 = vmatprep.subr.bf16.mxu0 %v2646_v1  ;;  %s1628_s8 = sld [smem:[#allocation2 + $0x8]] }
  0x83   :  { %1882 = vmatprep.subr.bf16.mxu1 %v2646_v1 }
  0x85   :  { %1863 = vmatpush3.bf16.msra.mxu0 %v2378_v9 }
  0x86   :  { %1883 = vmatpush3.bf16.msra.mxu1 %v2768_v10  ;;  %1864 = vmatprep.subr.bf16.mxu0 %v2646_v1 }
  0x87   :  { %1884 = vmatprep.subr.bf16.mxu1 %v2646_v1 }
  0x89   :  { %1865 = vmatpush3.bf16.msra.mxu0 %v2380_v11  ;;  %v264_v11 = vld [vmem:[#allocation9 + $0xc] sm:$0x3] }
  0x8a   :  { %1885 = vmatpush3.bf16.msra.mxu1 %v2773_v12  ;;  %1866 = vmatprep.subr.bf16.mxu0 %v2646_v1 }
  0x8b   :  { %1886 = vmatprep.subr.bf16.mxu1 %v2646_v1 }
  0x8d   :  { %1867 = vmatpush3.bf16.msra.mxu0 %v2382_v13 }
  0x8e   :  { %1887 = vmatpush3.bf16.msra.mxu1 %v2776_v14  ;;  %1868 = vmatprep.subr.bf16.mxu0 %v2646_v1 }
  0x8f   :  { %1888 = vmatprep.subr.bf16.mxu1 %v2646_v1 }
  0x91   :  { %1869 = vmatpush3.bf16.msra.mxu0 %v2384_v15 }
  0x92   :  { %1889 = vmatpush3.bf16.msra.mxu1 %v2781_v16  ;;  %1894 = vmatprep.subr.bf16.mxu0 %v2646_v1 }
  0x93   :  { %1914 = vmatprep.subr.bf16.mxu1 %v2646_v1 }
  0x94   :  { %1871 = vmatmul.mubr.bf16.vlgmr.msra.gmra.mxu0 %v153_v18 }
  0x95   :  { %1891 = vmatmul.mubr.bf16.vlgmr.msra.gmra.mxu1 %v330_v19  ;;  %1895 = vmatpush3.bf16.msra.mxu0 %v2790_v20 }
  0x96   :  { %1896 = vmatprep.subr.bf16.mxu0 %v2646_v1  ;;  %1910 = vmatprep.mubr.msk.bf16.mxu0 %vm2647_vm0, %v2646_v1 }
  0x97   :  { %1930 = vmatprep.mubr.msk.bf16.mxu1 %vm2647_vm0, %v2646_v1  ;;  %1915 = vmatpush3.bf16.msra.mxu1 %v2829_v28 }
  0x98   :  { %1916 = vmatprep.subr.bf16.mxu1 %v2646_v1 }
  0x99   :  { %1897 = vmatpush3.bf16.msra.mxu0 %v2796_v21 }
  0x9a   :  { %1898 = vmatprep.subr.bf16.mxu0 %v2646_v1 }
  0x9b   :  { %1917 = vmatpush3.bf16.msra.mxu1 %v2832_v29 }
  0x9c   :  { %1918 = vmatprep.subr.bf16.mxu1 %v2646_v1 }
  0x9d   :  { %1899 = vmatpush3.bf16.msra.mxu0 %v2804_v22 }
  0x9e   :  { %1900 = vmatprep.subr.bf16.mxu0 %v2646_v1 }
  0x9f   :  { %1919 = vmatpush3.bf16.msra.mxu1 %v2836_v30 }
  0xa0   :  { %1920 = vmatprep.subr.bf16.mxu1 %v2646_v1 }
  0xa1   :  { %1901 = vmatpush3.bf16.msra.mxu0 %v2808_v23 }
  0xa2   :  { %1902 = vmatprep.subr.bf16.mxu0 %v2646_v1 }
  0xa3   :  { %1921 = vmatpush3.bf16.msra.mxu1 %v2840_v31 }
  0xa4   :  { %1922 = vmatprep.subr.bf16.mxu1 %v2646_v1 }
  0xa5   :  { %1903 = vmatpush3.bf16.msra.mxu0 %v2812_v24 }
  0xa6   :  { %1904 = vmatprep.subr.bf16.mxu0 %v2646_v1 }
  0xa7   :  { %1923 = vmatpush3.bf16.msra.mxu1 %v2844_v32 }
  0xa8   :  { %1924 = vmatprep.subr.bf16.mxu1 %v2646_v1 }
  0xa9   :  { %1905 = vmatpush3.bf16.msra.mxu0 %v2816_v25 }
  0xaa   :  { %1906 = vmatprep.subr.bf16.mxu0 %v2646_v1 }
  0xab   :  { %1925 = vmatpush3.bf16.msra.mxu1 %v2848_v33 }
  0xac   :  { %1926 = vmatprep.subr.bf16.mxu1 %v2646_v1 }
  0xad   :  { %1907 = vmatpush3.bf16.msra.mxu0 %v2821_v26 }
  0xae   :  { %1908 = vmatprep.subr.bf16.mxu0 %v2646_v1 }
  0xaf   :  { %1927 = vmatpush3.bf16.msra.mxu1 %v2874_v47 }
  0xb0   :  { %1928 = vmatprep.subr.bf16.mxu1 %v2646_v1 }
  0xb1   :  { %1909 = vmatpush3.bf16.msra.mxu0 %v2825_v27 }
  0xb2   :  { %1934 = vmatprep.subr.bf16.mxu0 %v2646_v1 }
  0xb3   :  { %1929 = vmatpush3.bf16.msra.mxu1 %v2878_v48 }
  0xb4   :  { %1954 = vmatprep.subr.bf16.mxu1 %v2646_v1 }
 0x154   :  { %v2853_v35 = vpop.f32.mrf.mxu0 }
 0x155   :  { %v273_v36 = vadd.f32 %v265_v34, %v2853_v35  ;;  %v413_v37 = vpop.f32.mrf.mxu1  ;;  %v272_v13 = vadd.f32 %v264_v11, %v2853_v35 }
 0x156   :  { %v1872_v38 = vpop.f32.mrf.mxu0 }
 0x157   :  { %v414_v39 = vadd.f32 %v413_v37, %v273_v36  ;;  %v1892_v40 = vpop.f32.mrf.mxu1 }
 0x158   :  { %v255_v41 = vpop.f32.mrf.mxu0 }
 0x159   :  { %v419_v42 = vmax.f32 %v414_v39, 0.0  ;;  %v416_v43 = vpop.f32.mrf.mxu1 }
 0x15a   :  { %v1873_v44 = vpop.f32.mrf.mxu0 }
 0x15b   :  { %v420_v45 = vpack.c.bf16 %v419_v42, %v419_v42  ;;  %v1893_v46 = vpop.f32.mrf.mxu1 }
 0x15c   :  { %v738_v46 = vstv %s1611_s17 }
 0x15d   :  { %1911 = vmatmul.mubr.bf16.vlgmr.msra.gmra.mxu0 %v420_v45  ;;  %v735_v45 = vstv %s1610_s16  ;;  %s1560_s16 = sshll.u32 %s2648_s23, 4  ;;  %s1561_s16 = int_to_ptr.vmem [resolvable:$true] %s1560_s16 }
 0x15e   :  { %1935 = vmatpush3.bf16.msra.mxu0 %v2745_v2  ;;  %1950 = vmatprep.mubr.msk.bf16.mxu0 %vm2647_vm0, %v2646_v1  ;;  %s2599_s17 = scalar_lea.vmem %s1561_s16, 32  ;;  %p2604_p4 = scmp.lt.s32.totalorder %s1561_s16, %s1561_s16 }
 0x15f   :  { %1936 = vmatprep.subr.bf16.mxu0 %v2646_v1  ;;  %p2600_p3 = scmp.ne.s32.totalorder %s1561_s16, %s2599_s17  ;;  %p2605_p5 = scmp.lt.s32.totalorder %s2599_s17, %s2599_s17 }
 0x161   :  { %p2606_p6 = por %p2605_p5, %p2604_p4 }
 0x162   :  { %1937 = vmatpush3.bf16.msra.mxu0 %v2751_v4 }
 0x163   :  { %1938 = vmatprep.subr.bf16.mxu0 %v2646_v1  ;;  %p2607_p7 = pnand %p2606_p6, %p2600_p3 }
 0x166   :  { %1939 = vmatpush3.bf16.msra.mxu0 %v2758_v6 }
 0x167   :  { %1940 = vmatprep.subr.bf16.mxu0 %v2646_v1 }
 0x16a   :  { %1941 = vmatpush3.bf16.msra.mxu0 %v2763_v8 }
 0x16b   :  { %1942 = vmatprep.subr.bf16.mxu0 %v2646_v1 }
 0x16e   :  { %1943 = vmatpush3.bf16.msra.mxu0 %v2768_v10 }
 0x16f   :  { %1944 = vmatprep.subr.bf16.mxu0 %v2646_v1 }
 0x172   :  { %1945 = vmatpush3.bf16.msra.mxu0 %v2773_v12 }
 0x173   :  { %1946 = vmatprep.subr.bf16.mxu0 %v2646_v1 }
 0x176   :  { %1947 = vmatpush3.bf16.msra.mxu0 %v2776_v14 }
 0x177   :  { %1948 = vmatprep.subr.bf16.mxu0 %v2646_v1 }
 0x17a   :  { %1949 = vmatpush3.bf16.msra.mxu0 %v2781_v16 }
 0x17b   :  { %1974 = vmatprep.subr.bf16.mxu0 %v2646_v1 }
 0x21d   :  { %v503_v50 = vpop.f32.mrf.mxu0 }
 0x21e   :  { %v504_v51 = vadd.f32 %v2882_v49, %v503_v50 }
 0x21f   :  { %v1912_v52 = vpop.f32.mrf.mxu0 }
 0x220   :  { %v509_v53 = vmax.f32 %v504_v51, 0.0 }
 0x221   :  { %v506_v54 = vpop.f32.mrf.mxu0 }
 0x222   :  { %v510_v55 = vpack.c.bf16 %v509_v53, %v509_v53  ;;  %v1612_v53 = vld [vmem:[%s3337_s2 + $0xc] sm:$0x3] }
 0x223   :  { %v1913_v56 = vpop.f32.mrf.mxu0 }
 0x224   :  { %1931 = vmatmul.mubr.bf16.vlgmr.msra.gmra.mxu1 %v510_v55 }
 0x225   :  { %1955 = vmatpush3.bf16.msra.mxu1 %v2790_v20  ;;  %1970 = vmatprep.mubr.msk.bf16.mxu1 %vm2647_vm0, %v2646_v1 }
 0x226   :  { %1956 = vmatprep.subr.bf16.mxu1 %v2646_v1 }
 0x229   :  { %1957 = vmatpush3.bf16.msra.mxu1 %v2796_v21 }
 0x22a   :  { %1958 = vmatprep.subr.bf16.mxu1 %v2646_v1 }
 0x22d   :  { %1959 = vmatpush3.bf16.msra.mxu1 %v2804_v22 }
 0x22e   :  { %1960 = vmatprep.subr.bf16.mxu1 %v2646_v1 }
 0x231   :  { %1961 = vmatpush3.bf16.msra.mxu1 %v2808_v23 }
 0x232   :  { %1962 = vmatprep.subr.bf16.mxu1 %v2646_v1 }
 0x235   :  { %1963 = vmatpush3.bf16.msra.mxu1 %v2812_v24 }
 0x236   :  { %1964 = vmatprep.subr.bf16.mxu1 %v2646_v1 }
 0x239   :  { %1965 = vmatpush3.bf16.msra.mxu1 %v2816_v25 }
 0x23a   :  { %1966 = vmatprep.subr.bf16.mxu1 %v2646_v1 }
 0x23d   :  { %1967 = vmatpush3.bf16.msra.mxu1 %v2821_v26 }
 0x23e   :  { %1968 = vmatprep.subr.bf16.mxu1 %v2646_v1 }
 0x241   :  { %1969 = vmatpush3.bf16.msra.mxu1 %v2825_v27 }
 0x242   :  { %1994 = vmatprep.subr.bf16.mxu1 %v2646_v1 }
 0x2e4   :  { %v593_v60 = vpop.f32.mrf.mxu1 }
 0x2e5   :  { %v604_v61 = vmul.f32 %v603_v58, %v593_v60  ;;  %v263_v60 = vld [vmem:[#allocation9 + $0xa] sm:$0x3] }
 0x2e6   :  { %v1932_v63 = vpop.f32.mrf.mxu1 }
 0x2e7   :  { %v605_v0 = vsub.f32 %v601_v59, %v604_v61  ;;  %v271_v61 = vadd.f32 %v263_v60, %v2853_v35 }
 0x2e8   :  { %v596_v3 = vpop.f32.mrf.mxu1 }
 0x2e9   :  { %v2907_v5 = vadd.f32 %v1609_v62, %v605_v0 }
 0x2ea   :  { %v1933_v7 = vpop.f32.mrf.mxu1 }
 0x2eb   :  { %v609_v9 = vpack.c.bf16 %v2907_v5, %v2907_v5  ;;  %v736_v51 = vmul.f32 %v735_v45, %v2907_v5 }
 0x2ed   :  { %1951 = vmatmul.mubr.bf16.vlgmr.msra.gmra.mxu0 %v609_v9 }
 0x2ee   :  { %1975 = vmatpush3.bf16.msra.mxu0 %v2829_v28  ;;  %1990 = vmatprep.mubr.msk.bf16.mxu0 %vm2647_vm0, %v2646_v1 }
 0x2ef   :  { %1976 = vmatprep.subr.bf16.mxu0 %v2646_v1 }
 0x2f2   :  { %1977 = vmatpush3.bf16.msra.mxu0 %v2832_v29 }
 0x2f3   :  { %1978 = vmatprep.subr.bf16.mxu0 %v2646_v1 }
 0x2f6   :  { %1979 = vmatpush3.bf16.msra.mxu0 %v2836_v30 }
 0x2f7   :  { %1980 = vmatprep.subr.bf16.mxu0 %v2646_v1 }
 0x2fa   :  { %1981 = vmatpush3.bf16.msra.mxu0 %v2840_v31 }
 0x2fb   :  { %1982 = vmatprep.subr.bf16.mxu0 %v2646_v1 }
 0x2fe   :  { %1983 = vmatpush3.bf16.msra.mxu0 %v2844_v32 }
 0x2ff   :  { %1984 = vmatprep.subr.bf16.mxu0 %v2646_v1 }
 0x302   :  { %1985 = vmatpush3.bf16.msra.mxu0 %v2848_v33 }
 0x303   :  { %1986 = vmatprep.subr.bf16.mxu0 %v2646_v1 }
 0x306   :  { %1987 = vmatpush3.bf16.msra.mxu0 %v2874_v47 }
 0x307   :  { %1988 = vmatprep.subr.bf16.mxu0 %v2646_v1 }
 0x30a   :  { %1989 = vmatpush3.bf16.msra.mxu0 %v2878_v48 }
 0x30b   :  { %2014 = vmatprep.subr.bf16.mxu0 %v2646_v1 }
 0x3ad   :  { %v644_v15 = vpop.f32.mrf.mxu0 }
 0x3ae   :  { %v645_v17 = vadd.f32 %v644_v15, %v272_v13 }
 0x3af   :  { %v1952_v18 = vpop.f32.mrf.mxu0 }
 0x3b0   :  { %v650_v19 = vmax.f32 %v645_v17, 0.0 }
 0x3b1   :  { %v647_v34 = vpop.f32.mrf.mxu0 }
 0x3b2   :  { %v651_v36 = vpack.c.bf16 %v650_v19, %v650_v19 }
 0x3b3   :  { %v1953_v37 = vpop.f32.mrf.mxu0 }
 0x3b4   :  { %1971 = vmatmul.mubr.bf16.vlgmr.msra.gmra.mxu1 %v651_v36  ;;  %v870_v36 = vstv %s1613_s19  ;;  %v873_v37 = vstv %s1614_s20 }
 0x3b5   :  { %1995 = vmatpush3.bf16.msra.mxu1 %v2745_v2  ;;  %2010 = vmatprep.mubr.msk.bf16.mxu1 %vm2647_vm0, %v2646_v1 }
 0x3b6   :  { %1996 = vmatprep.subr.bf16.mxu1 %v2646_v1 }
 0x3b9   :  { %1997 = vmatpush3.bf16.msra.mxu1 %v2751_v4 }
 0x3ba   :  { %1998 = vmatprep.subr.bf16.mxu1 %v2646_v1 }
 0x3bd   :  { %1999 = vmatpush3.bf16.msra.mxu1 %v2758_v6 }
 0x3be   :  { %2000 = vmatprep.subr.bf16.mxu1 %v2646_v1 }
 0x3c1   :  { %2001 = vmatpush3.bf16.msra.mxu1 %v2763_v8 }
 0x3c2   :  { %2002 = vmatprep.subr.bf16.mxu1 %v2646_v1 }
 0x3c5   :  { %2003 = vmatpush3.bf16.msra.mxu1 %v2768_v10 }
 0x3c6   :  { %2004 = vmatprep.subr.bf16.mxu1 %v2646_v1 }
 0x3c9   :  { %2005 = vmatpush3.bf16.msra.mxu1 %v2773_v12 }
 0x3ca   :  { %2006 = vmatprep.subr.bf16.mxu1 %v2646_v1 }
 0x3cd   :  { %2007 = vmatpush3.bf16.msra.mxu1 %v2776_v14 }
 0x3ce   :  { %2008 = vmatprep.subr.bf16.mxu1 %v2646_v1 }
 0x3d1   :  { %2009 = vmatpush3.bf16.msra.mxu1 %v2781_v16 }
 0x3d2   :  { %2034 = vmatprep.subr.bf16.mxu1 %v2646_v1 }
 0x474   :  { %v686_v38 = vpop.f32.mrf.mxu1 }
 0x475   :  { %v687_v39 = vadd.f32 %v2882_v49, %v686_v38 }
 0x476   :  { %v1972_v40 = vpop.f32.mrf.mxu1 }
 0x477   :  { %v692_v41 = vmax.f32 %v687_v39, 0.0 }
 0x478   :  { %v689_v42 = vpop.f32.mrf.mxu1 }
 0x479   :  { %v693_v43 = vpack.c.bf16 %v692_v41, %v692_v41  ;;  %v1615_v41 = vld [vmem:[%s3337_s2 + $0xa] sm:$0x3] }
 0x47a   :  { %v1973_v44 = vpop.f32.mrf.mxu1 }
 0x47b   :  { %1991 = vmatmul.mubr.bf16.vlgmr.msra.gmra.mxu0 %v693_v43 }
 0x47c   :  { %2015 = vmatpush3.bf16.msra.mxu0 %v2790_v20  ;;  %2030 = vmatprep.mubr.msk.bf16.mxu0 %vm2647_vm0, %v2646_v1 }
 0x47d   :  { %2016 = vmatprep.subr.bf16.mxu0 %v2646_v1 }
 0x480   :  { %2017 = vmatpush3.bf16.msra.mxu0 %v2796_v21 }
 0x481   :  { %2018 = vmatprep.subr.bf16.mxu0 %v2646_v1 }
 0x484   :  { %2019 = vmatpush3.bf16.msra.mxu0 %v2804_v22 }
 0x485   :  { %2020 = vmatprep.subr.bf16.mxu0 %v2646_v1 }
 0x488   :  { %2021 = vmatpush3.bf16.msra.mxu0 %v2808_v23 }
 0x489   :  { %2022 = vmatprep.subr.bf16.mxu0 %v2646_v1 }
 0x48c   :  { %2023 = vmatpush3.bf16.msra.mxu0 %v2812_v24 }
 0x48d   :  { %2024 = vmatprep.subr.bf16.mxu0 %v2646_v1 }
 0x490   :  { %2025 = vmatpush3.bf16.msra.mxu0 %v2816_v25 }
 0x491   :  { %2026 = vmatprep.subr.bf16.mxu0 %v2646_v1 }
 0x494   :  { %2027 = vmatpush3.bf16.msra.mxu0 %v2821_v26 }
 0x495   :  { %2028 = vmatprep.subr.bf16.mxu0 %v2646_v1 }
 0x498   :  { %2029 = vmatpush3.bf16.msra.mxu0 %v2825_v27 }
 0x499   :  { %2054 = vmatprep.subr.bf16.mxu0 %v2646_v1 }
 0x53b   :  { %v728_v50 = vpop.f32.mrf.mxu0 }
 0x53c   :  { %v739_v52 = vmul.f32 %v738_v46, %v728_v50 }
 0x53d   :  { %v1992_v54 = vpop.f32.mrf.mxu0 }
 0x53e   :  { %v740_v55 = vsub.f32 %v736_v51, %v739_v52  ;;  %v262_v51 = vld [vmem:[#allocation9 + $0x8] sm:$0x3] }
 0x53f   :  { %v731_v56 = vpop.f32.mrf.mxu0  ;;  %v270_v52 = vadd.f32 %v262_v51, %v2853_v35 }
 0x540   :  { %v2971_v57 = vadd.f32 %v1612_v53, %v740_v55 }
 0x541   :  { %v1993_v58 = vpop.f32.mrf.mxu0 }
 0x542   :  { %v744_v59 = vpack.c.bf16 %v2971_v57, %v2971_v57  ;;  %v871_v39 = vmul.f32 %v870_v36, %v2971_v57 }
 0x544   :  { %2011 = vmatmul.mubr.bf16.vlgmr.msra.gmra.mxu1 %v744_v59 }
 0x545   :  { %2035 = vmatpush3.bf16.msra.mxu1 %v2829_v28  ;;  %2050 = vmatprep.mubr.msk.bf16.mxu1 %vm2647_vm0, %v2646_v1 }
 0x546   :  { %2036 = vmatprep.subr.bf16.mxu1 %v2646_v1 }
 0x549   :  { %2037 = vmatpush3.bf16.msra.mxu1 %v2832_v29 }
 0x54a   :  { %2038 = vmatprep.subr.bf16.mxu1 %v2646_v1 }
 0x54d   :  { %2039 = vmatpush3.bf16.msra.mxu1 %v2836_v30 }
 0x54e   :  { %2040 = vmatprep.subr.bf16.mxu1 %v2646_v1 }
 0x551   :  { %2041 = vmatpush3.bf16.msra.mxu1 %v2840_v31 }
 0x552   :  { %2042 = vmatprep.subr.bf16.mxu1 %v2646_v1 }
 0x555   :  { %2043 = vmatpush3.bf16.msra.mxu1 %v2844_v32 }
 0x556   :  { %2044 = vmatprep.subr.bf16.mxu1 %v2646_v1 }
 0x559   :  { %2045 = vmatpush3.bf16.msra.mxu1 %v2848_v33 }
 0x55a   :  { %2046 = vmatprep.subr.bf16.mxu1 %v2646_v1 }
 0x55d   :  { %2047 = vmatpush3.bf16.msra.mxu1 %v2874_v47 }
 0x55e   :  { %2048 = vmatprep.subr.bf16.mxu1 %v2646_v1 }
 0x561   :  { %2049 = vmatpush3.bf16.msra.mxu1 %v2878_v48 }
 0x562   :  { %2074 = vmatprep.subr.bf16.mxu1 %v2646_v1 }
 0x604   :  { %v779_v62 = vpop.f32.mrf.mxu1 }
 0x605   :  { %v780_v63 = vadd.f32 %v779_v62, %v271_v61 }
 0x606   :  { %v2012_v0 = vpop.f32.mrf.mxu1 }
 0x607   :  { %v785_v3 = vmax.f32 %v780_v63, 0.0 }
 0x608   :  { %v782_v5 = vpop.f32.mrf.mxu1 }
 0x609   :  { %v786_v7 = vpack.c.bf16 %v785_v3, %v785_v3  ;;  %v1005_v5 = vstv %s1616_s25 }
 0x60a   :  { %v2013_v9 = vpop.f32.mrf.mxu1 }
 0x60b   :  { %2031 = vmatmul.mubr.bf16.vlgmr.msra.gmra.mxu0 %v786_v7  ;;  %v1008_v7 = vstv %s1617_s26 }
 0x60c   :  { %2055 = vmatpush3.bf16.msra.mxu0 %v2745_v2  ;;  %2070 = vmatprep.mubr.msk.bf16.mxu0 %vm2647_vm0, %v2646_v1 }
 0x60d   :  { %2056 = vmatprep.subr.bf16.mxu0 %v2646_v1 }
 0x610   :  { %2057 = vmatpush3.bf16.msra.mxu0 %v2751_v4 }
 0x611   :  { %2058 = vmatprep.subr.bf16.mxu0 %v2646_v1 }
 0x614   :  { %2059 = vmatpush3.bf16.msra.mxu0 %v2758_v6 }
 0x615   :  { %2060 = vmatprep.subr.bf16.mxu0 %v2646_v1 }
 0x618   :  { %2061 = vmatpush3.bf16.msra.mxu0 %v2763_v8 }
 0x619   :  { %2062 = vmatprep.subr.bf16.mxu0 %v2646_v1 }
 0x61c   :  { %2063 = vmatpush3.bf16.msra.mxu0 %v2768_v10 }
 0x61d   :  { %2064 = vmatprep.subr.bf16.mxu0 %v2646_v1 }
 0x620   :  { %2065 = vmatpush3.bf16.msra.mxu0 %v2773_v12 }
 0x621   :  { %2066 = vmatprep.subr.bf16.mxu0 %v2646_v1 }
 0x624   :  { %2067 = vmatpush3.bf16.msra.mxu0 %v2776_v14 }
 0x625   :  { %2068 = vmatprep.subr.bf16.mxu0 %v2646_v1 }
 0x628   :  { %2069 = vmatpush3.bf16.msra.mxu0 %v2781_v16 }
 0x629   :  { %2094 = vmatprep.subr.bf16.mxu0 %v2646_v1 }
 0x6cb   :  { %v821_v11 = vpop.f32.mrf.mxu0 }
 0x6cc   :  { %v822_v13 = vadd.f32 %v2882_v49, %v821_v11 }
 0x6cd   :  { %v2032_v15 = vpop.f32.mrf.mxu0 }
 0x6ce   :  { %v827_v17 = vmax.f32 %v822_v13, 0.0  ;;  %v1618_v15 = vld [vmem:[%s3337_s2 + $0x8] sm:$0x3] }
 0x6cf   :  { %v824_v18 = vpop.f32.mrf.mxu0 }
 0x6d0   :  { %v828_v19 = vpack.c.bf16 %v827_v17, %v827_v17 }
 0x6d1   :  { %v2033_v34 = vpop.f32.mrf.mxu0 }
 0x6d2   :  { %2051 = vmatmul.mubr.bf16.vlgmr.msra.gmra.mxu1 %v828_v19 }
 0x6d3   :  { %2075 = vmatpush3.bf16.msra.mxu1 %v2790_v20  ;;  %2090 = vmatprep.mubr.msk.bf16.mxu1 %vm2647_vm0, %v2646_v1 }
 0x6d4   :  { %2076 = vmatprep.subr.bf16.mxu1 %v2646_v1 }
 0x6d7   :  { %2077 = vmatpush3.bf16.msra.mxu1 %v2796_v21 }
 0x6d8   :  { %2078 = vmatprep.subr.bf16.mxu1 %v2646_v1 }
 0x6db   :  { %2079 = vmatpush3.bf16.msra.mxu1 %v2804_v22 }
 0x6dc   :  { %2080 = vmatprep.subr.bf16.mxu1 %v2646_v1 }
 0x6df   :  { %2081 = vmatpush3.bf16.msra.mxu1 %v2808_v23 }
 0x6e0   :  { %2082 = vmatprep.subr.bf16.mxu1 %v2646_v1 }
 0x6e3   :  { %2083 = vmatpush3.bf16.msra.mxu1 %v2812_v24 }
 0x6e4   :  { %2084 = vmatprep.subr.bf16.mxu1 %v2646_v1 }
 0x6e7   :  { %2085 = vmatpush3.bf16.msra.mxu1 %v2816_v25 }
 0x6e8   :  { %2086 = vmatprep.subr.bf16.mxu1 %v2646_v1 }
 0x6eb   :  { %2087 = vmatpush3.bf16.msra.mxu1 %v2821_v26 }
 0x6ec   :  { %2088 = vmatprep.subr.bf16.mxu1 %v2646_v1 }
 0x6ef   :  { %2089 = vmatpush3.bf16.msra.mxu1 %v2825_v27 }
 0x6f0   :  { %2114 = vmatprep.subr.bf16.mxu1 %v2646_v1 }
 0x792   :  { %v863_v38 = vpop.f32.mrf.mxu1 }
 0x793   :  { %v874_v40 = vmul.f32 %v873_v37, %v863_v38  ;;  %v261_v38 = vld [vmem:[#allocation9 + $0x6] sm:$0x3] }
 0x794   :  { %v2052_v42 = vpop.f32.mrf.mxu1 }
 0x795   :  { %v875_v43 = vsub.f32 %v871_v39, %v874_v40  ;;  %v269_v39 = vadd.f32 %v261_v38, %v2853_v35  ;;  %v3221_v38 = vld [vmem:[#allocation13 + $0x38] sm:$0xff]  }
 0x796   :  { %v866_v44 = vpop.f32.mrf.mxu1 }
 0x797   :  { %v3035_v45 = vadd.f32 %v1615_v41, %v875_v43 }
 0x798   :  { %v2053_v46 = vpop.f32.mrf.mxu1 }
 0x799   :  { %v879_v50 = vpack.c.bf16 %v3035_v45, %v3035_v45  ;;  %v1006_v11 = vmul.f32 %v1005_v5, %v3035_v45  ;;  %v3200_v5 = vld [vmem:[#allocation12 + $0x20] sm:$0xff]  }
 0x79b   :  { %2071 = vmatmul.mubr.bf16.vlgmr.msra.gmra.mxu0 %v879_v50  ;;  %v3122_v50 = vld [vmem:[#allocation12 + $0x38] sm:$0xff]  }
 0x79c   :  { %2095 = vmatpush3.bf16.msra.mxu0 %v2829_v28  ;;  %2110 = vmatprep.mubr.msk.bf16.mxu0 %vm2647_vm0, %v2646_v1 }
 0x79d   :  { %2096 = vmatprep.subr.bf16.mxu0 %v2646_v1 }
 0x7a0   :  { %2097 = vmatpush3.bf16.msra.mxu0 %v2832_v29 }
 0x7a1   :  { %2098 = vmatprep.subr.bf16.mxu0 %v2646_v1 }
 0x7a4   :  { %2099 = vmatpush3.bf16.msra.mxu0 %v2836_v30 }
 0x7a5   :  { %2100 = vmatprep.subr.bf16.mxu0 %v2646_v1 }
 0x7a8   :  { %2101 = vmatpush3.bf16.msra.mxu0 %v2840_v31 }
 0x7a9   :  { %2102 = vmatprep.subr.bf16.mxu0 %v2646_v1 }
 0x7ac   :  { %2103 = vmatpush3.bf16.msra.mxu0 %v2844_v32 }
 0x7ad   :  { %2104 = vmatprep.subr.bf16.mxu0 %v2646_v1 }
 0x7b0   :  { %2105 = vmatpush3.bf16.msra.mxu0 %v2848_v33 }
 0x7b1   :  { %2106 = vmatprep.subr.bf16.mxu0 %v2646_v1 }
 0x7b4   :  { %2107 = vmatpush3.bf16.msra.mxu0 %v2874_v47 }
 0x7b5   :  { %2108 = vmatprep.subr.bf16.mxu0 %v2646_v1 }
 0x7b8   :  { %2109 = vmatpush3.bf16.msra.mxu0 %v2878_v48 }
 0x7b9   :  { %2134 = vmatprep.subr.bf16.mxu0 %v2646_v1 }
 0x85b   :  { %v914_v53 = vpop.f32.mrf.mxu0 }
 0x85c   :  { %v915_v54 = vadd.f32 %v914_v53, %v270_v52 }
 0x85d   :  { %v2072_v55 = vpop.f32.mrf.mxu0 }
 0x85e   :  { %v920_v56 = vmax.f32 %v915_v54, 0.0  ;;  %v1621_v55 = vld [vmem:[%s3337_s2 + $0x6] sm:$0x3] }
 0x85f   :  { %v917_v57 = vpop.f32.mrf.mxu0 }
 0x860   :  { %v921_v58 = vpack.c.bf16 %v920_v56, %v920_v56 }
 0x861   :  { %v2073_v59 = vpop.f32.mrf.mxu0 }
 0x862   :  { %2091 = vmatmul.mubr.bf16.vlgmr.msra.gmra.mxu1 %v921_v58 }
 0x863   :  { %2115 = vmatpush3.bf16.msra.mxu1 %v2745_v2  ;;  %2130 = vmatprep.mubr.msk.bf16.mxu1 %vm2647_vm0, %v2646_v1 }
 0x864   :  { %2116 = vmatprep.subr.bf16.mxu1 %v2646_v1 }
 0x867   :  { %2117 = vmatpush3.bf16.msra.mxu1 %v2751_v4 }
 0x868   :  { %2118 = vmatprep.subr.bf16.mxu1 %v2646_v1 }
 0x86b   :  { %2119 = vmatpush3.bf16.msra.mxu1 %v2758_v6 }
 0x86c   :  { %2120 = vmatprep.subr.bf16.mxu1 %v2646_v1 }
 0x86f   :  { %2121 = vmatpush3.bf16.msra.mxu1 %v2763_v8 }
 0x870   :  { %2122 = vmatprep.subr.bf16.mxu1 %v2646_v1 }
 0x873   :  { %2123 = vmatpush3.bf16.msra.mxu1 %v2768_v10 }
 0x874   :  { %2124 = vmatprep.subr.bf16.mxu1 %v2646_v1 }
 0x877   :  { %2125 = vmatpush3.bf16.msra.mxu1 %v2773_v12 }
 0x878   :  { %2126 = vmatprep.subr.bf16.mxu1 %v2646_v1 }
 0x87b   :  { %2127 = vmatpush3.bf16.msra.mxu1 %v2776_v14 }
 0x87c   :  { %2128 = vmatprep.subr.bf16.mxu1 %v2646_v1 }
 0x87f   :  { %2129 = vmatpush3.bf16.msra.mxu1 %v2781_v16 }
 0x880   :  { %2154 = vmatprep.subr.bf16.mxu1 %v2646_v1 }
 0x922   :  { %v956_v2 = vpop.f32.mrf.mxu1 }
 0x923   :  { %v957_v60 = vadd.f32 %v2882_v49, %v956_v2 }
 0x924   :  { %v2092_v61 = vpop.f32.mrf.mxu1 }
 0x925   :  { %v962_v62 = vmax.f32 %v957_v60, 0.0 }
 0x926   :  { %v959_v63 = vpop.f32.mrf.mxu1 }
 0x927   :  { %v963_v0 = vpack.c.bf16 %v962_v62, %v962_v62 }
 0x928   :  { %v2093_v3 = vpop.f32.mrf.mxu1 }
 0x929   :  { %2111 = vmatmul.mubr.bf16.vlgmr.msra.gmra.mxu0 %v963_v0  ;;  %v3192_v0 = vld [vmem:[#allocation12 + $0x30] sm:$0xff]   ;;  %v3196_v3 = vld [vmem:[#allocation12 + $0x28] sm:$0xff]  }
 0x92a   :  { %2135 = vmatpush3.bf16.msra.mxu0 %v2790_v20  ;;  %2150 = vmatprep.mubr.msk.bf16.mxu0 %vm2647_vm0, %v2646_v1 }
 0x92b   :  { %2136 = vmatprep.subr.bf16.mxu0 %v2646_v1 }
 0x92e   :  { %2137 = vmatpush3.bf16.msra.mxu0 %v2796_v21 }
 0x92f   :  { %2138 = vmatprep.subr.bf16.mxu0 %v2646_v1 }
 0x932   :  { %2139 = vmatpush3.bf16.msra.mxu0 %v2804_v22 }
 0x933   :  { %2140 = vmatprep.subr.bf16.mxu0 %v2646_v1 }
 0x936   :  { %2141 = vmatpush3.bf16.msra.mxu0 %v2808_v23 }
 0x937   :  { %2142 = vmatprep.subr.bf16.mxu0 %v2646_v1 }
 0x93a   :  { %2143 = vmatpush3.bf16.msra.mxu0 %v2812_v24 }
 0x93b   :  { %2144 = vmatprep.subr.bf16.mxu0 %v2646_v1 }
 0x93e   :  { %2145 = vmatpush3.bf16.msra.mxu0 %v2816_v25 }
 0x93f   :  { %2146 = vmatprep.subr.bf16.mxu0 %v2646_v1 }
 0x942   :  { %2147 = vmatpush3.bf16.msra.mxu0 %v2821_v26 }
 0x943   :  { %2148 = vmatprep.subr.bf16.mxu0 %v2646_v1 }
 0x946   :  { %2149 = vmatpush3.bf16.msra.mxu0 %v2825_v27 }
 0x947   :  { %2174 = vmatprep.subr.bf16.mxu0 %v2646_v1 }
 0x9e9   :  { %v998_v9 = vpop.f32.mrf.mxu0 }
 0x9ea   :  { %v1009_v13 = vmul.f32 %v1008_v7, %v998_v9  ;;  %v3204_v7 = vld [vmem:[#allocation12 + $0x18] sm:$0xff]   ;;  %v3208_v9 = vld [vmem:[#allocation12 + $0x10] sm:$0xff]  }
 0x9eb   :  { %v2112_v17 = vpop.f32.mrf.mxu0 }
 0x9ec   :  { %v1010_v18 = vsub.f32 %v1006_v11, %v1009_v13  ;;  %v3212_v11 = vld [vmem:[#allocation12 + $0x8] sm:$0xff]   ;;  %v3216_v13 = vld [vmem:[#allocation12] sm:$0xff]  }
 0x9ed   :  { %v1001_v19 = vpop.f32.mrf.mxu0 }
 0x9ee   :  { %v3099_v34 = vadd.f32 %v1618_v15, %v1010_v18 }
 0x9ef   :  { %v2113_v36 = vpop.f32.mrf.mxu0 }
 0x9f0   :  { %v1014_v37 = vpack.c.bf16 %v3099_v34, %v3099_v34 }
 0x9f2   :  { %2131 = vmatmul.mubr.bf16.vlgmr.msra.gmra.mxu1 %v1014_v37 }
 0x9f3   :  { %2155 = vmatpush3.bf16.msra.mxu1 %v2829_v28  ;;  %2170 = vmatprep.mubr.msk.bf16.mxu1 %vm2647_vm0, %v2646_v1 }
 0x9f4   :  { %2156 = vmatprep.subr.bf16.mxu1 %v2646_v1 }
 0x9f7   :  { %2157 = vmatpush3.bf16.msra.mxu1 %v2832_v29 }
 0x9f8   :  { %2158 = vmatprep.subr.bf16.mxu1 %v2646_v1 }
 0x9fb   :  { %2159 = vmatpush3.bf16.msra.mxu1 %v2836_v30 }
 0x9fc   :  { %2160 = vmatprep.subr.bf16.mxu1 %v2646_v1 }
 0x9ff   :  { %2161 = vmatpush3.bf16.msra.mxu1 %v2840_v31 }
 0xa00   :  { %2162 = vmatprep.subr.bf16.mxu1 %v2646_v1 }
 0xa03   :  { %2163 = vmatpush3.bf16.msra.mxu1 %v2844_v32 }
 0xa04   :  { %2164 = vmatprep.subr.bf16.mxu1 %v2646_v1 }
 0xa07   :  { %2165 = vmatpush3.bf16.msra.mxu1 %v2848_v33 }
 0xa08   :  { %2166 = vmatprep.subr.bf16.mxu1 %v2646_v1 }
 0xa0b   :  { %2167 = vmatpush3.bf16.msra.mxu1 %v2874_v47 }
 0xa0c   :  { %2168 = vmatprep.subr.bf16.mxu1 %v2646_v1 }
 0xa0f   :  { %2169 = vmatpush3.bf16.msra.mxu1 %v2878_v48 }
 0xa10   :  { %2194 = vmatprep.subr.bf16.mxu1 %v2646_v1 }
 0xab2   :  { %v1049_v40 = vpop.f32.mrf.mxu1 }
 0xab3   :  { %v1050_v41 = vadd.f32 %v1049_v40, %v269_v39 }
 0xab4   :  { %v2132_v42 = vpop.f32.mrf.mxu1 }
 0xab5   :  { %v1055_v43 = vmax.f32 %v1050_v41, 0.0 }
 0xab6   :  { %v1052_v44 = vpop.f32.mrf.mxu1 }
 0xab7   :  { %v1056_v45 = vpack.c.bf16 %v1055_v43, %v1055_v43  ;;  %v3249_v44 = vld [vmem:[#allocation15 + $0x38] sm:$0xff]  }
 0xab8   :  { %v2133_v46 = vpop.f32.mrf.mxu1 }
 0xab9   :  { %2151 = vmatmul.mubr.bf16.vlgmr.msra.gmra.mxu0 %v1056_v45  ;;  %v3255_v45 = vld [vmem:[#allocation15 + $0x30] sm:$0xff]   ;;  %v3259_v46 = vld [vmem:[#allocation15 + $0x28] sm:$0xff]  }
 0xaba   :  { %2175 = vmatpush3.bf16.msra.mxu0 %v3122_v50  ;;  %2190 = vmatprep.mubr.msk.bf16.mxu0 %vm2647_vm0, %v2646_v1 }
 0xabb   :  { %2176 = vmatprep.subr.bf16.mxu0 %v2646_v1 }
 0xabe   :  { %2177 = vmatpush3.bf16.msra.mxu0 %v2751_v4 }
 0xabf   :  { %2178 = vmatprep.subr.bf16.mxu0 %v2646_v1 }
 0xac2   :  { %2179 = vmatpush3.bf16.msra.mxu0 %v2758_v6 }
 0xac3   :  { %2180 = vmatprep.subr.bf16.mxu0 %v2646_v1 }
 0xac6   :  { %2181 = vmatpush3.bf16.msra.mxu0 %v2763_v8 }
 0xac7   :  { %2182 = vmatprep.subr.bf16.mxu0 %v2646_v1 }
 0xaca   :  { %2183 = vmatpush3.bf16.msra.mxu0 %v2768_v10 }
 0xacb   :  { %2184 = vmatprep.subr.bf16.mxu0 %v2646_v1 }
 0xace   :  { %2185 = vmatpush3.bf16.msra.mxu0 %v2773_v12  ;;  %v1140_v12 = vstv %s1619_s28 }
 0xacf   :  { %2186 = vmatprep.subr.bf16.mxu0 %v2646_v1 }
 0xad2   :  { %2187 = vmatpush3.bf16.msra.mxu0 %v2776_v14  ;;  %v1143_v14 = vstv %s1620_s1 }
 0xad3   :  { %2188 = vmatprep.subr.bf16.mxu0 %v2646_v1 }
 0xad6   :  { %2189 = vmatpush3.bf16.msra.mxu0 %v2781_v16 }
 0xad7   :  { %2214 = vmatprep.subr.bf16.mxu0 %v2646_v1 }
 0xb79   :  { %v1091_v4 = vpop.f32.mrf.mxu0 }
 0xb7a   :  { %v1092_v6 = vadd.f32 %v2882_v49, %v1091_v4  ;;  %v3263_v4 = vld [vmem:[#allocation15 + $0x20] sm:$0xff]  }
 0xb7b   :  { %v2152_v8 = vpop.f32.mrf.mxu0 }
 0xb7c   :  { %v1097_v51 = vmax.f32 %v1092_v6, 0.0  ;;  %v3267_v6 = vld [vmem:[#allocation15 + $0x18] sm:$0xff]   ;;  %v3271_v8 = vld [vmem:[#allocation15 + $0x10] sm:$0xff]  }
 0xb7d   :  { %v1094_v10 = vpop.f32.mrf.mxu0 }
 0xb7e   :  { %v1098_v52 = vpack.c.bf16 %v1097_v51, %v1097_v51  ;;  %v259_v51 = vld [vmem:[#allocation9 + $0x2] sm:$0x3] }
 0xb7f   :  { %v2153_v53 = vpop.f32.mrf.mxu0  ;;  %v267_v10 = vadd.f32 %v259_v51, %v2853_v35 }
 0xb80   :  { %2171 = vmatmul.mubr.bf16.vlgmr.msra.gmra.mxu1 %v1098_v52 }
 0xb81   :  { %2195 = vmatpush3.bf16.msra.mxu1 %v2790_v20  ;;  %2210 = vmatprep.mubr.msk.bf16.mxu1 %vm2647_vm0, %v2646_v1  ;;  %v1141_v20 = vmul.f32 %v1140_v12, %v3099_v34 }
 0xb82   :  { %2196 = vmatprep.subr.bf16.mxu1 %v2646_v1 }
 0xb85   :  { %2197 = vmatpush3.bf16.msra.mxu1 %v2796_v21 }
 0xb86   :  { %2198 = vmatprep.subr.bf16.mxu1 %v2646_v1 }
 0xb89   :  { %2199 = vmatpush3.bf16.msra.mxu1 %v2804_v22 }
 0xb8a   :  { %2200 = vmatprep.subr.bf16.mxu1 %v2646_v1 }
 0xb8d   :  { %2201 = vmatpush3.bf16.msra.mxu1 %v2808_v23 }
 0xb8e   :  { %2202 = vmatprep.subr.bf16.mxu1 %v2646_v1 }
 0xb91   :  { %2203 = vmatpush3.bf16.msra.mxu1 %v2812_v24 }
 0xb92   :  { %2204 = vmatprep.subr.bf16.mxu1 %v2646_v1 }
 0xb95   :  { %2205 = vmatpush3.bf16.msra.mxu1 %v2816_v25 }
 0xb96   :  { %2206 = vmatprep.subr.bf16.mxu1 %v2646_v1 }
 0xb99   :  { %2207 = vmatpush3.bf16.msra.mxu1 %v2821_v26 }
 0xb9a   :  { %2208 = vmatprep.subr.bf16.mxu1 %v2646_v1 }
 0xb9d   :  { %2209 = vmatpush3.bf16.msra.mxu1 %v2825_v27 }
 0xb9e   :  { %2234 = vmatprep.subr.bf16.mxu1 %v2646_v1 }
 0xc40   :  { %v1133_v16 = vpop.f32.mrf.mxu1 }
 0xc41   :  { %v1144_v54 = vmul.f32 %v1143_v14, %v1133_v16 }
 0xc42   :  { %v2172_v56 = vpop.f32.mrf.mxu1 }
 0xc43   :  { %v1145_v57 = vsub.f32 %v1141_v20, %v1144_v54 }
 0xc44   :  { %v1136_v58 = vpop.f32.mrf.mxu1 }
 0xc45   :  { %v3165_v59 = vadd.f32 %v1621_v55, %v1145_v57 }
 0xc46   :  { %v2173_v2 = vpop.f32.mrf.mxu1 }
 0xc47   :  { %v1149_v60 = vpack.c.bf16 %v3165_v59, %v3165_v59  ;;  %v2418_v2 = vld [vmem:[#allocation13 + $0x28] sm:$0xff]  }
 0xc49   :  { %2191 = vmatmul.mubr.bf16.vlgmr.msra.gmra.mxu0 %v1149_v60  ;;  %v2420_v60 = vld [vmem:[#allocation13 + $0x18] sm:$0xff]  }
 0xc4a   :  { %2215 = vmatpush3.bf16.msra.mxu0 %v2829_v28  ;;  %2230 = vmatprep.mubr.msk.bf16.mxu0 %vm2647_vm0, %v2646_v1  ;;  %v260_v28 = vld [vmem:[#allocation9 + $0x4] sm:$0x3] }
 0xc4b   :  { %2216 = vmatprep.subr.bf16.mxu0 %v2646_v1 }
 0xc4e   :  { %2217 = vmatpush3.bf16.msra.mxu0 %v2832_v29  ;;  %v268_v29 = vadd.f32 %v260_v28, %v2853_v35  ;;  %v2421_v28 = vld [vmem:[#allocation13 + $0x10] sm:$0xff]  }
 0xc4f   :  { %2218 = vmatprep.subr.bf16.mxu0 %v2646_v1 }
 0xc52   :  { %2219 = vmatpush3.bf16.msra.mxu0 %v2836_v30 }
 0xc53   :  { %2220 = vmatprep.subr.bf16.mxu0 %v2646_v1 }
 0xc56   :  { %2221 = vmatpush3.bf16.msra.mxu0 %v2840_v31 }
 0xc57   :  { %2222 = vmatprep.subr.bf16.mxu0 %v2646_v1 }
 0xc5a   :  { %2223 = vmatpush3.bf16.msra.mxu0 %v2844_v32 }
 0xc5b   :  { %2224 = vmatprep.subr.bf16.mxu0 %v2646_v1 }
 0xc5e   :  { %2225 = vmatpush3.bf16.msra.mxu0 %v2848_v33 }
 0xc5f   :  { %2226 = vmatprep.subr.bf16.mxu0 %v2646_v1 }
 0xc62   :  { %2227 = vmatpush3.bf16.msra.mxu0 %v2874_v47 }
 0xc63   :  { %2228 = vmatprep.subr.bf16.mxu0 %v2646_v1 }
 0xc66   :  { %2229 = vmatpush3.bf16.msra.mxu0 %v2878_v48 }
 0xc67   :  { %2254 = vmatprep.subr.bf16.mxu0 %v2646_v1 }
 0xd09   :  { %v1184_v30 = vpop.f32.mrf.mxu0 }
 0xd0a   :  { %v1185_v31 = vadd.f32 %v1184_v30, %v268_v29  ;;  %v2422_v29 = vld [vmem:[#allocation13 + $0x8] sm:$0xff]   ;;  %v2423_v30 = vld [vmem:[#allocation13] sm:$0xff]  }
 0xd0b   :  { %v2192_v32 = vpop.f32.mrf.mxu0 }
 0xd0c   :  { %v1190_v61 = vmax.f32 %v1185_v31, 0.0  ;;  %v1410_v31 = vstv %s1625_s0  ;;  %v1413_v32 = vstv %s1626_s13 }
 0xd0d   :  { %v1187_v62 = vpop.f32.mrf.mxu0 }
 0xd0e   :  { %v1191_v63 = vpack.c.bf16 %v1190_v61, %v1190_v61 }
 0xd0f   :  { %v2193_v33 = vpop.f32.mrf.mxu0 }
 0xd10   :  { %2211 = vmatmul.mubr.bf16.vlgmr.msra.gmra.mxu1 %v1191_v63  ;;  %v1627_v33 = vld [vmem:[%s3337_s2 + $0x2] sm:$0x3] }
 0xd11   :  { %2235 = vmatpush3.bf16.msra.mxu1 %v3122_v50  ;;  %2250 = vmatprep.mubr.msk.bf16.mxu1 %vm2647_vm0, %v2646_v1 }
 0xd12   :  { %2236 = vmatprep.subr.bf16.mxu1 %v2646_v1 }
 0xd15   :  { %2237 = vmatpush3.bf16.msra.mxu1 %v3192_v0 }
 0xd16   :  { %2238 = vmatprep.subr.bf16.mxu1 %v2646_v1 }
 0xd19   :  { %2239 = vmatpush3.bf16.msra.mxu1 %v3196_v3 }
 0xd1a   :  { %2240 = vmatprep.subr.bf16.mxu1 %v2646_v1 }
 0xd1d   :  { %2241 = vmatpush3.bf16.msra.mxu1 %v3200_v5 }
 0xd1e   :  { %2242 = vmatprep.subr.bf16.mxu1 %v2646_v1 }
 0xd21   :  { %2243 = vmatpush3.bf16.msra.mxu1 %v3204_v7 }
 0xd22   :  { %2244 = vmatprep.subr.bf16.mxu1 %v2646_v1 }
 0xd25   :  { %2245 = vmatpush3.bf16.msra.mxu1 %v3208_v9 }
 0xd26   :  { %2246 = vmatprep.subr.bf16.mxu1 %v2646_v1 }
 0xd29   :  { %2247 = vmatpush3.bf16.msra.mxu1 %v3212_v11 }
 0xd2a   :  { %2248 = vmatprep.subr.bf16.mxu1 %v2646_v1 }
 0xd2d   :  { %2249 = vmatpush3.bf16.msra.mxu1 %v3216_v13 }
 0xd2e   :  { %2274 = vmatprep.subr.bf16.mxu1 %v2646_v1 }
 0xdd0   :  { %v1226_v15 = vpop.f32.mrf.mxu1 }
 0xdd1   :  { %v1227_v17 = vadd.f32 %v2882_v49, %v1226_v15  ;;  %v2425_v15 = vld [vmem:[#allocation15] sm:$0xff]  }
 0xdd2   :  { %v2212_v18 = vpop.f32.mrf.mxu1 }
 0xdd3   :  { %v1232_v19 = vmax.f32 %v1227_v17, 0.0  ;;  %v258_v17 = vld [vmem:[#allocation9] sm:$0x3] }
 0xdd4   :  { %v1229_v34 = vpop.f32.mrf.mxu1  ;;  %v266_v18 = vadd.f32 %v258_v17, %v2853_v35  ;;  %v1545_v35 = vstv %s1544_s15 }
 0xdd5   :  { %v1233_v36 = vpack.c.bf16 %v1232_v19, %v1232_v19 }
 0xdd6   :  { %v2213_v37 = vpop.f32.mrf.mxu1 }
 0xdd7   :  { %2231 = vmatmul.mubr.bf16.vlgmr.msra.gmra.mxu0 %v1233_v36 }
 0xdd8   :  { %2255 = vmatpush3.bf16.msra.mxu0 %v3221_v38  ;;  %2270 = vmatprep.mubr.msk.bf16.mxu0 %vm2647_vm0, %v2646_v1 }
 0xdd9   :  { %2256 = vmatprep.subr.bf16.mxu0 %v2646_v1 }
 0xddc   :  { %2257 = vmatpush3.bf16.msra.mxu0 %v2796_v21  ;;  %v1275_v21 = vstv %s1622_s4 }
 0xddd   :  { %2258 = vmatprep.subr.bf16.mxu0 %v2646_v1 }
 0xde0   :  { %2259 = vmatpush3.bf16.msra.mxu0 %v2804_v22  ;;  %v1278_v22 = vstv %s1623_s11 }
 0xde1   :  { %2260 = vmatprep.subr.bf16.mxu0 %v2646_v1 }
 0xde4   :  { %2261 = vmatpush3.bf16.msra.mxu0 %v2808_v23 }
 0xde5   :  { %2262 = vmatprep.subr.bf16.mxu0 %v2646_v1 }
 0xde8   :  { %2263 = vmatpush3.bf16.msra.mxu0 %v2812_v24  ;;  %v1276_v24 = vmul.f32 %v1275_v21, %v3165_v59  ;;  %v2417_v59 = vld [vmem:[#allocation13 + $0x30] sm:$0xff]  }
 0xde9   :  { %2264 = vmatprep.subr.bf16.mxu0 %v2646_v1 }
 0xdec   :  { %2265 = vmatpush3.bf16.msra.mxu0 %v2816_v25  ;;  %v1624_v25 = vld [vmem:[%s3337_s2 + $0x4] sm:$0x3] }
 0xded   :  { %2266 = vmatprep.subr.bf16.mxu0 %v2646_v1 }
 0xdf0   :  { %2267 = vmatpush3.bf16.msra.mxu0 %v2821_v26 }
 0xdf1   :  { %2268 = vmatprep.subr.bf16.mxu0 %v2646_v1 }
 0xdf4   :  { %2269 = vmatpush3.bf16.msra.mxu0 %v2825_v27 }
 0xdf5   :  { %2294 = vmatprep.subr.bf16.mxu0 %v2646_v1 }
 0xe97   :  { %v1268_v23 = vpop.f32.mrf.mxu0 }
 0xe98   :  { %v1279_v39 = vmul.f32 %v1278_v22, %v1268_v23 }
 0xe99   :  { %v2232_v40 = vpop.f32.mrf.mxu0 }
 0xe9a   :  { %v1280_v26 = vsub.f32 %v1276_v24, %v1279_v39  ;;  %v2426_v24 = vld [vmem:[#allocation16] ss:$0 sm:$0xff] }
 0xe9b   :  { %v1271_v41 = vpop.f32.mrf.mxu0 }
 0xe9c   :  { %v3245_v42 = vadd.f32 %v1624_v25, %v1280_v26 }
 0xe9d   :  { %v2233_v27 = vpop.f32.mrf.mxu0 }
 0xe9e   :  { %v1284_v43 = vpack.c.bf16 %v3245_v42, %v3245_v42  ;;  %v1411_v62 = vmul.f32 %v1410_v31, %v3245_v42  ;;  %v1548_v42 = vstv %s1628_s8 }
 0xea0   :  { %2251 = vmatmul.mubr.bf16.vlgmr.msra.gmra.mxu1 %v1284_v43 }
 0xea1   :  { %2275 = vmatpush3.bf16.msra.mxu1 %v3249_v44  ;;  %2290 = vmatprep.mubr.msk.bf16.mxu1 %vm2647_vm0, %v2646_v1 }
 0xea2   :  { %2276 = vmatprep.subr.bf16.mxu1 %v2646_v1 }
 0xea5   :  { %2277 = vmatpush3.bf16.msra.mxu1 %v3255_v45 }
 0xea6   :  { %2278 = vmatprep.subr.bf16.mxu1 %v2646_v1 }
 0xea9   :  { %2279 = vmatpush3.bf16.msra.mxu1 %v3259_v46 }
 0xeaa   :  { %2280 = vmatprep.subr.bf16.mxu1 %v2646_v1 }
 0xead   :  { %2281 = vmatpush3.bf16.msra.mxu1 %v3263_v4 }
 0xeae   :  { %2282 = vmatprep.subr.bf16.mxu1 %v2646_v1 }
 0xeb1   :  { %2283 = vmatpush3.bf16.msra.mxu1 %v3267_v6 }
 0xeb2   :  { %2284 = vmatprep.subr.bf16.mxu1 %v2646_v1 }
 0xeb5   :  { %2285 = vmatpush3.bf16.msra.mxu1 %v3271_v8 }
 0xeb6   :  { %2286 = vmatprep.subr.bf16.mxu1 %v2646_v1 }
 0xeb9   :  { %2287 = vmatpush3.bf16.msra.mxu1 %v2874_v47 }
 0xeba   :  { %2288 = vmatprep.subr.bf16.mxu1 %v2646_v1 }
 0xebd   :  { %2289 = vmatpush3.bf16.msra.mxu1 %v2878_v48 }
 0xebe   :  { %2314 = vmatprep.subr.bf16.mxu1 %v2646_v1 }
 0xf60   :  { %v1319_v52 = vpop.f32.mrf.mxu1 }
 0xf61   :  { %v1320_v53 = vadd.f32 %v1319_v52, %v267_v10 }
 0xf62   :  { %v2252_v12 = vpop.f32.mrf.mxu1 }
 0xf63   :  { %v1325_v14 = vmax.f32 %v1320_v53, 0.0 }
 0xf64   :  { %v1322_v16 = vpop.f32.mrf.mxu1 }
 0xf65   :  { %v1326_v20 = vpack.c.bf16 %v1325_v14, %v1325_v14 }
 0xf66   :  { %v2253_v54 = vpop.f32.mrf.mxu1 }
 0xf67   :  { %2271 = vmatmul.mubr.bf16.vlgmr.msra.gmra.mxu0 %v1326_v20 }
 0xf68   :  { %2295 = vmatpush3.bf16.msra.mxu0 %v3122_v50  ;;  %2310 = vmatprep.mubr.msk.bf16.mxu0 %vm2647_vm0, %v2646_v1 }
 0xf69   :  { %2296 = vmatprep.subr.bf16.mxu0 %v2646_v1 }
 0xf6c   :  { %2297 = vmatpush3.bf16.msra.mxu0 %v3192_v0 }
 0xf6d   :  { %2298 = vmatprep.subr.bf16.mxu0 %v2646_v1 }
 0xf70   :  { %2299 = vmatpush3.bf16.msra.mxu0 %v3196_v3 }
 0xf71   :  { %2300 = vmatprep.subr.bf16.mxu0 %v2646_v1 }
 0xf74   :  { %2301 = vmatpush3.bf16.msra.mxu0 %v3200_v5 }
 0xf75   :  { %2302 = vmatprep.subr.bf16.mxu0 %v2646_v1 }
 0xf78   :  { %2303 = vmatpush3.bf16.msra.mxu0 %v3204_v7 }
 0xf79   :  { %2304 = vmatprep.subr.bf16.mxu0 %v2646_v1 }
 0xf7c   :  { %2305 = vmatpush3.bf16.msra.mxu0 %v3208_v9 }
 0xf7d   :  { %2306 = vmatprep.subr.bf16.mxu0 %v2646_v1 }
 0xf80   :  { %2307 = vmatpush3.bf16.msra.mxu0 %v3212_v11 }
 0xf81   :  { %2308 = vmatprep.subr.bf16.mxu0 %v2646_v1 }
 0xf84   :  { %2309 = vmatpush3.bf16.msra.mxu0 %v3216_v13  ;;  %v2424_v13 = vld [vmem:[#allocation15 + $0x8] sm:$0xff]  }
 0xf85   :  { %2334 = vmatprep.subr.bf16.mxu0 %v2646_v1 }
0x1027   :  { %v1361_v47 = vpop.f32.mrf.mxu0 }
0x1028   :  { %v1362_v48 = vadd.f32 %v2882_v49, %v1361_v47  ;;  %v2419_v49 = vld [vmem:[#allocation13 + $0x20] sm:$0xff]  }
0x1029   :  { %v2272_v50 = vpop.f32.mrf.mxu0 }
0x102a   :  { %v1367_v55 = vmax.f32 %v1362_v48, 0.0 }
0x102b   :  { %v1364_v56 = vpop.f32.mrf.mxu0 }
0x102c   :  { %v1368_v57 = vpack.c.bf16 %v1367_v55, %v1367_v55 }
0x102d   :  { %v2273_v58 = vpop.f32.mrf.mxu0 }
0x102e   :  { %2291 = vmatmul.mubr.bf16.vlgmr.msra.gmra.mxu1 %v1368_v57 }
0x102f   :  { %2315 = vmatpush3.bf16.msra.mxu1 %v3221_v38  ;;  %2330 = vmatprep.mubr.msk.bf16.mxu1 %vm2647_vm0, %v2646_v1 }
0x1030   :  { %2316 = vmatprep.subr.bf16.mxu1 %v2646_v1 }
0x1033   :  { %2317 = vmatpush3.bf16.msra.mxu1 %v2417_v59 }
0x1034   :  { %2318 = vmatprep.subr.bf16.mxu1 %v2646_v1 }
0x1037   :  { %2319 = vmatpush3.bf16.msra.mxu1 %v2418_v2 }
0x1038   :  { %2320 = vmatprep.subr.bf16.mxu1 %v2646_v1 }
0x103b   :  { %2321 = vmatpush3.bf16.msra.mxu1 %v2419_v49 }
0x103c   :  { %2322 = vmatprep.subr.bf16.mxu1 %v2646_v1 }
0x103f   :  { %2323 = vmatpush3.bf16.msra.mxu1 %v2420_v60 }
0x1040   :  { %2324 = vmatprep.subr.bf16.mxu1 %v2646_v1 }
0x1043   :  { %2325 = vmatpush3.bf16.msra.mxu1 %v2421_v28 }
0x1044   :  { %2326 = vmatprep.subr.bf16.mxu1 %v2646_v1 }
0x1047   :  { %2327 = vmatpush3.bf16.msra.mxu1 %v2422_v29 }
0x1048   :  { %2328 = vmatprep.subr.bf16.mxu1 %v2646_v1 }
0x104b   :  { %2329 = vmatpush3.bf16.msra.mxu1 %v2423_v30 }
0x10ee   :  { %v1403_v61 = vpop.f32.mrf.mxu1 }
0x10ef   :  { %v1414_v63 = vmul.f32 %v1413_v32, %v1403_v61 }
0x10f0   :  { %v2292_v0 = vpop.f32.mrf.mxu1 }
0x10f1   :  { %v1415_v3 = vsub.f32 %v1411_v62, %v1414_v63 }
0x10f2   :  { %v1406_v5 = vpop.f32.mrf.mxu1 }
0x10f3   :  { %v1418_v7 = vadd.f32 %v1627_v33, %v1415_v3 }
0x10f4   :  { %v2293_v9 = vpop.f32.mrf.mxu1 }
0x10f5   :  { %v1419_v11 = vpack.c.bf16 %v1418_v7, %v1418_v7  ;;  %v1546_v43 = vmul.f32 %v1545_v35, %v1418_v7 }
0x10f7   :  { %2311 = vmatmul.mubr.bf16.vlgmr.msra.gmra.mxu0 %v1419_v11 }
0x10f8   :  { %2335 = vmatpush3.bf16.msra.mxu0 %v3249_v44  ;;  %2350 = vmatprep.mubr.msk.bf16.mxu0 %vm2647_vm0, %v2646_v1 }
0x10f9   :  { %2336 = vmatprep.subr.bf16.mxu0 %v2646_v1 }
0x10fc   :  { %2337 = vmatpush3.bf16.msra.mxu0 %v3255_v45 }
0x10fd   :  { %2338 = vmatprep.subr.bf16.mxu0 %v2646_v1 }
0x1100   :  { %2339 = vmatpush3.bf16.msra.mxu0 %v3259_v46  ;;  %v1551_v46 = vld [vmem:[%s3337_s2] sm:$0x3] }
0x1101   :  { %2340 = vmatprep.subr.bf16.mxu0 %v2646_v1 }
0x1104   :  { %2341 = vmatpush3.bf16.msra.mxu0 %v3263_v4 }
0x1105   :  { %2342 = vmatprep.subr.bf16.mxu0 %v2646_v1 }
0x1108   :  { %2343 = vmatpush3.bf16.msra.mxu0 %v3267_v6 }
0x1109   :  { %2344 = vmatprep.subr.bf16.mxu0 %v2646_v1 }
0x110c   :  { %2345 = vmatpush3.bf16.msra.mxu0 %v3271_v8 }
0x110d   :  { %2346 = vmatprep.subr.bf16.mxu0 %v2646_v1 }
0x1110   :  { %2347 = vmatpush3.bf16.msra.mxu0 %v2424_v13 }
0x1111   :  { %2348 = vmatprep.subr.bf16.mxu0 %v2646_v1 }
0x1114   :  { %2349 = vmatpush3.bf16.msra.mxu0 %v2425_v15 }
0x11b7   :  { %v1454_v19 = vpop.f32.mrf.mxu0 }
0x11b8   :  { %v1455_v34 = vadd.f32 %v1454_v19, %v266_v18 }
0x11b9   :  { %v2312_v36 = vpop.f32.mrf.mxu0 }
0x11ba   :  { %v1460_v37 = vmax.f32 %v1455_v34, 0.0 }
0x11bb   :  { %v1457_v38 = vpop.f32.mrf.mxu0 }
0x11bc   :  { %v1461_v21 = vpack.c.bf16 %v1460_v37, %v1460_v37 }
0x11bd   :  { %v2313_v22 = vpop.f32.mrf.mxu0 }
0x11be   :  { %2331 = vmatmul.mubr.bf16.vlgmr.msra.gmra.mxu1 %v1461_v21 }
0x127e   :  { %v1496_v23 = vpop.f32.mrf.mxu1 }
0x127f   :  { %v1497_v39 = vadd.f32 %v2426_v24, %v1496_v23 }
0x1280   :  { %v2332_v25 = vpop.f32.mrf.mxu1 }
0x1281   :  { %v1502_v40 = vmax.f32 %v1497_v39, 0.0 }
0x1282   :  { %v1499_v26 = vpop.f32.mrf.mxu1 }
0x1283   :  { %v1503_v1 = vpack.c.bf16 %v1502_v40, %v1502_v40 }
0x1284   :  { %v2333_v41 = vpop.f32.mrf.mxu1 }
0x1285   :  { %2351 = vmatmul.mubr.bf16.vlgmr.msra.gmra.mxu0 %v1503_v1 }
0x1345   :  { %v1538_v27 = vpop.f32.mrf.mxu0 }
0x1346   :  { %v1549_v44 = vmul.f32 %v1548_v42, %v1538_v27 }
0x1347   :  { %v2352_v45 = vpop.f32.mrf.mxu0 }
0x1348   :  { %v1550_v4 = vsub.f32 %v1546_v43, %v1549_v44 }
0x1349   :  { %v1541_v6 = vpop.f32.mrf.mxu0 }
0x134a   :  { %v1552_v8 = vadd.f32 %v1551_v46, %v1550_v4 }
0x134b   :  { %v2353_v51 = vpop.f32.mrf.mxu0 }
0x134c   :  { %1553 = vst [vmem:[#allocation18] sm:$0x3] %v1552_v8 }
0x134d   :  { %2610 = shalt.err (!%p2607_p7)
}
0x134e   :  { %1563 = dma.vmem_to_hbm [thread:$0]  %s1561_s16, 32, %s3345_s10, [#allocation4]  }
0x134f   :  { %2631 = dma.done.wait [#allocation4], 32  }
0x1350   :  { %2632 = vsyncadd [#allocation4], 4294967264 }
0x1351   :  { %1567 = vsyncpa [#allocation3], 1 }
0x1352   :  { %1568 = vsyncpa [#allocation8], 1 }
0x1353   :  { %1569 = vsyncpa [#allocation11], 1 }
0x1354   :  { %1570 = vsyncpa [#allocation14], 1 }
0x1355   :  { %1571 = vsyncpa [#allocation17], 1 }
0x1356   :  { %1572 = vsyncpa [#allocation4], 1 }
0x1357   :  { %1573 = vsyncpa [#allocation5], 1 }

</bundles_post_ra>
